<compile_context>
chip_gen: v7x
topology: tpu7x:2x2x1
jax: 0.10.0
libtpu: 0.0.40
codegen_flags: <defaults>
</compile_context>

<pallas_src>
import functools
import math

import jax
import jax.numpy as jnp
from jax.experimental import pallas as pl
from jax.experimental.pallas import tpu as pltpu

EMBED_DIM = 256          # embed_dim
COND_C = 64              # c (true conditioning width)
COND_PAD = 128           # zero-padded to a full lane tile
IN_X = 512
IN_TOK = 512
OUT_DIM = 512
N_HIDDEN = 5             # Linear(embed_dim, embed_dim) layers in self.net
SIGMA = 25.0             # VE-SDE sigma for marginal_prob_std
FOURIER_SCALE = 30.0
TWO_PI = 2.0 * math.pi

_BF16 = jnp.bfloat16


def _round_up(n, m):
    return ((n + m - 1) // m) * m


# ---------------------------------------------------------------------------
# Pallas kernel: one batch tile per grid step, weights VMEM-resident
# ---------------------------------------------------------------------------

def _mymlp_kernel(t_ref, x_ref, tok_ref,
                  wf_ref, we_sin_ref, we_cos_ref, be_ref,
                  w1x_ref, w1t_ref, w1e_ref, b1_ref,
                  wh_ref, bh_ref,
                  wo_ref, bo_ref,
                  o_ref, *, sigma):
    log_sigma = math.log(sigma)
    t = t_ref[...]                                                   # (bt, 1) f32

    # --- self.embed: GaussianFourierProjection -> Linear(embed_dim, c) ---
    # 2*pi already folded into wf; sin/cos halves split so no lane concat.
    proj = t * wf_ref[...]                                           # (bt, 128) f32
    emb = (jnp.dot(jnp.sin(proj).astype(_BF16), we_sin_ref[...],
                   preferred_element_type=jnp.float32)
           + jnp.dot(jnp.cos(proj).astype(_BF16), we_cos_ref[...],
                     preferred_element_type=jnp.float32)
           + be_ref[...])                                            # (bt, 128) f32
    # self.act = x * sigmoid(x)  (swish), kept in f32 (v5e has no bf16 VPU/EUP)
    emb = emb * jax.nn.sigmoid(emb)

    # --- net[0]: Linear(512 + 512 + c, embed_dim) on cat([x, token, embed]) ---
    # concat folded into three bf16 matmuls against the pre-split weight.
    h = (jnp.dot(x_ref[...].astype(_BF16), w1x_ref[...],
                 preferred_element_type=jnp.float32)
         + jnp.dot(tok_ref[...].astype(_BF16), w1t_ref[...],
                   preferred_element_type=jnp.float32)
         + jnp.dot(emb.astype(_BF16), w1e_ref[...],
                   preferred_element_type=jnp.float32)
         + b1_ref[...])                                              # (bt, 256) f32
    h = jnp.maximum(h, 0.0)                                          # ReLU

    # --- net[2..11]: 5 x (Linear(embed_dim, embed_dim) + ReLU), unrolled ---
    for i in range(N_HIDDEN):
        h = jnp.dot(h.astype(_BF16), wh_ref[i],
                    preferred_element_type=jnp.float32) + bh_ref[i]
        h = jnp.maximum(h, 0.0)

    # --- net[12]: Linear(embed_dim, 512) ---
    h = jnp.dot(h.astype(_BF16), wo_ref[...],
                preferred_element_type=jnp.float32) + bo_ref[...]    # (bt, 512)

    # --- h / marginal_prob_std(t)[:, None]  (VE-SDE std), divide -> EUP recip ---
    std = jnp.sqrt((jnp.exp((2.0 * log_sigma) * t) - 1.0) * (0.5 / log_sigma))
    o_ref[...] = (h * pl.reciprocal(std, approx=True)).astype(o_ref.dtype)


def mymlp_forward(params, x, t, token, *, b_tile=512):
    """x: (B, 512); t: (B,); token: (B, 512) -> (B, 512) float32."""
    B = x.shape[0]
    bt = min(b_tile, _round_up(B, 8))          # batch tile (multiple of 8 sublanes)
    Bp = _round_up(B, bt)                      # padded batch

    if Bp != B:
        pad = Bp - B
        x = jnp.pad(x, ((0, pad), (0, 0)))
        token = jnp.pad(token, ((0, pad), (0, 0)))
        t = jnp.pad(t, (0, pad), constant_values=1.0)   # std(1) finite -> no NaN
    t2 = t.reshape(Bp, 1).astype(jnp.float32)

    operands = [
        t2, x, token,
        params["fourier_w"],                          # (1, 128)   f32 (2*pi folded)
        params["we_sin"], params["we_cos"],           # (128, 128) bf16 each
        params["be"],                                 # (1, 128)   f32
        params["w1x"], params["w1t"], params["w1e"],  # (512,256),(512,256),(128,256) bf16
        params["b1"],                                 # (1, 256)   f32
        params["wh"],                                 # (5, 256, 256) bf16
        params["bh"],                                 # (5, 1, 256)   f32
        params["wo"],                                 # (256, 512) bf16
        params["bo"],                                 # (1, 512)   f32
    ]

    def batch_spec(cols):
        return pl.BlockSpec((bt, cols), lambda i: (i, 0))

    def const_spec(shape):
        rank = len(shape)
        return pl.BlockSpec(shape, lambda i, _r=rank: (0,) * _r)

    in_specs = ([batch_spec(1), batch_spec(IN_X), batch_spec(IN_TOK)]
                + [const_spec(op.shape) for op in operands[3:]])

    out = pl.pallas_call(
        functools.partial(_mymlp_kernel, sigma=SIGMA),
        out_shape=jax.ShapeDtypeStruct((Bp, OUT_DIM), jnp.float32),
        grid_spec=pltpu.PrefetchScalarGridSpec(
            num_scalar_prefetch=0,
            grid=(Bp // bt,),
            in_specs=in_specs,
            out_specs=batch_spec(OUT_DIM),
        ),
        compiler_params=pltpu.CompilerParams(
            dimension_semantics=("parallel",)),
    )(*operands)
    return out[:B]


# ---------------------------------------------------------------------------
# Parameters (PyTorch-style init; pre-transposed to (in, out), weights bf16,
# 2*pi folded into Fourier W, conditioning width zero-padded 64 -> 128)
# ---------------------------------------------------------------------------

def init_params(key):
    ks = jax.random.split(key, 10)

    def lin(k, fan_in, fan_out):
        kw, kb = jax.random.split(k)
        bound = 1.0 / math.sqrt(fan_in)
        w = jax.random.uniform(kw, (fan_in, fan_out), jnp.float32, -bound, bound)
        b = jax.random.uniform(kb, (1, fan_out), jnp.float32, -bound, bound)
        return w, b

    bf = lambda a: a.astype(_BF16)

    # GaussianFourierProjection.W (frozen): randn(embed_dim // 2) * scale; fold 2*pi.
    fourier_w = (jax.random.normal(ks[0], (1, EMBED_DIM // 2), jnp.float32)
                 * FOURIER_SCALE * TWO_PI)

    we, be = lin(ks[1], EMBED_DIM, COND_C)                       # Linear(256, 64)
    we_p = jnp.pad(we, ((0, 0), (0, COND_PAD - COND_C)))         # zero-pad cols -> 128
    be_p = jnp.pad(be, ((0, 0), (0, COND_PAD - COND_C)))

    w1, b1 = lin(ks[2], IN_X + IN_TOK + COND_C, EMBED_DIM)       # Linear(1088, 256)
    w1e = jnp.pad(w1[IN_X + IN_TOK:], ((0, COND_PAD - COND_C), (0, 0)))  # rows -> 128

    wh_list, bh_list = [], []
    for i in range(N_HIDDEN):                                    # 5 x Linear(256, 256)
        w, b = lin(ks[3 + i], EMBED_DIM, EMBED_DIM)
        wh_list.append(w)
        bh_list.append(b)
    wo, bo = lin(ks[8], EMBED_DIM, OUT_DIM)                      # Linear(256, 512)

    return {
        "fourier_w": fourier_w,                       # f32
        "we_sin": bf(we_p[:EMBED_DIM // 2]),          # rows hit by sin(proj)
        "we_cos": bf(we_p[EMBED_DIM // 2:]),          # rows hit by cos(proj)
        "be": be_p,                                   # f32
        "w1x": bf(w1[:IN_X]),                         # rows hit by x
        "w1t": bf(w1[IN_X:IN_X + IN_TOK]),            # rows hit by token
        "w1e": bf(w1e),                               # rows hit by embed (padded)
        "b1": b1,                                     # f32
        "wh": bf(jnp.stack(wh_list)),                 # (5, 256, 256)
        "bh": jnp.stack(bh_list),                     # (5, 1, 256) f32
        "wo": bf(wo),
        "bo": bo,                                     # f32
    }


# ---------------------------------------------------------------------------
# Pure-JAX reference (mirrors MyMLP.forward; same bf16 operands / f32 accum)
# ---------------------------------------------------------------------------

def mymlp_ref(params, x, t, token):
    dot = functools.partial(jnp.dot, preferred_element_type=jnp.float32)
    proj = t[:, None] * params["fourier_w"]                              # (B, 128)
    emb = (dot(jnp.sin(proj).astype(_BF16), params["we_sin"])
           + dot(jnp.cos(proj).astype(_BF16), params["we_cos"])
           + params["be"])
    emb = emb * jax.nn.sigmoid(emb)                                      # swish
    h = (dot(x.astype(_BF16), params["w1x"])
         + dot(token.astype(_BF16), params["w1t"])
         + dot(emb.astype(_BF16), params["w1e"])
         + params["b1"])
    h = jnp.maximum(h, 0.0)
    for i in range(N_HIDDEN):
        h = jnp.maximum(dot(h.astype(_BF16), params["wh"][i]) + params["bh"][i], 0.0)
    h = dot(h.astype(_BF16), params["wo"]) + params["bo"]
    log_sigma = math.log(SIGMA)
    std = jnp.sqrt((jnp.exp(2.0 * t * log_sigma) - 1.0) / (2.0 * log_sigma))
    return h / std[:, None]


# ---------------------------------------------------------------------------

if __name__ == "__main__":
    key = jax.random.PRNGKey(0)
    kp, kx, kk, kt = jax.random.split(key, 4)
    params = init_params(kp)

    B = 2
    x = jax.random.normal(kx, (B, IN_X), jnp.float32)
    token = jax.random.normal(kk, (B, IN_TOK), jnp.float32)
    t = jax.random.uniform(kt, (B,), jnp.float32, minval=1e-3, maxval=1.0)

    h = jax.block_until_ready(mymlp_forward(params, x, t, token))
    assert h.shape == (B, OUT_DIM), h.shape

    # TODO(synk): marginal_prob_std is a constructor-injected callable in the
    # reference code; the standard VE-SDE std with sigma=25 is used here (same
    # formula in kernel and reference).
    h_ref = mymlp_ref(params, x, t, token)
    err = float(jnp.max(jnp.abs(h - h_ref)))
    # bf16 MXU operands + approx reciprocal -> looser tolerance than f32-HIGHEST.
    assert jnp.allclose(h, h_ref, atol=2e-2, rtol=2e-2), err

    print("KERNEL_OK")
</pallas_src>

<mosaic_0001>
module attributes {stable_mosaic.version = 11 : i64} {
  func.func @_mymlp_kernel(%arg0: i32, %arg1: memref<8x1xf32, #tpu.memory_space<vmem>>, %arg2: memref<8x512xf32, #tpu.memory_space<vmem>>, %arg3: memref<8x512xf32, #tpu.memory_space<vmem>>, %arg4: memref<1x128xf32, #tpu.memory_space<vmem>>, %arg5: memref<128x128xbf16, #tpu.memory_space<vmem>>, %arg6: memref<128x128xbf16, #tpu.memory_space<vmem>>, %arg7: memref<1x128xf32, #tpu.memory_space<vmem>>, %arg8: memref<512x256xbf16, #tpu.memory_space<vmem>>, %arg9: memref<512x256xbf16, #tpu.memory_space<vmem>>, %arg10: memref<128x256xbf16, #tpu.memory_space<vmem>>, %arg11: memref<1x256xf32, #tpu.memory_space<vmem>>, %arg12: memref<5x256x256xbf16, #tpu.memory_space<vmem>>, %arg13: memref<5x1x256xf32, #tpu.memory_space<vmem>>, %arg14: memref<256x512xbf16, #tpu.memory_space<vmem>>, %arg15: memref<1x512xf32, #tpu.memory_space<vmem>>, %arg16: memref<8x512xf32, #tpu.memory_space<vmem>>) attributes {dimension_semantics = [#tpu.dimension_semantics<parallel>], iteration_bounds = array<i64: 1>, scalar_prefetch = 0 : i64, scratch_operands = 0 : i64, tpu.core_type = #tpu.core_type<tc>, window_params = [{transform_indices = @transform_0, window_bounds = array<i64: 8, 1>}, {transform_indices = @transform_1, window_bounds = array<i64: 8, 512>}, {transform_indices = @transform_2, window_bounds = array<i64: 8, 512>}, {pipeline_mode = #tpu.pipeline_mode<synchronous>, transform_indices = @transform_3, window_bounds = array<i64: 1, 128>}, {pipeline_mode = #tpu.pipeline_mode<synchronous>, transform_indices = @transform_4, window_bounds = array<i64: 128, 128>}, {pipeline_mode = #tpu.pipeline_mode<synchronous>, transform_indices = @transform_5, window_bounds = array<i64: 128, 128>}, {pipeline_mode = #tpu.pipeline_mode<synchronous>, transform_indices = @transform_6, window_bounds = array<i64: 1, 128>}, {pipeline_mode = #tpu.pipeline_mode<synchronous>, transform_indices = @transform_7, window_bounds = array<i64: 512, 256>}, {pipeline_mode = #tpu.pipeline_mode<synchronous>, transform_indices = @transform_8, window_bounds = array<i64: 512, 256>}, {pipeline_mode = #tpu.pipeline_mode<synchronous>, transform_indices = @transform_9, window_bounds = array<i64: 128, 256>}, {pipeline_mode = #tpu.pipeline_mode<synchronous>, transform_indices = @transform_10, window_bounds = array<i64: 1, 256>}, {pipeline_mode = #tpu.pipeline_mode<synchronous>, transform_indices = @transform_11, window_bounds = array<i64: 5, 256, 256>}, {pipeline_mode = #tpu.pipeline_mode<synchronous>, transform_indices = @transform_12, window_bounds = array<i64: 5, 1, 256>}, {pipeline_mode = #tpu.pipeline_mode<synchronous>, transform_indices = @transform_13, window_bounds = array<i64: 256, 512>}, {pipeline_mode = #tpu.pipeline_mode<synchronous>, transform_indices = @transform_14, window_bounds = array<i64: 1, 512>}, {transform_indices = @transform_15, window_bounds = array<i64: 8, 512>}]} {
    %c0 = arith.constant 0 : index
    %c0_0 = arith.constant 0 : index
    %0 = vector.load %arg1[%c0, %c0_0] : memref<8x1xf32, #tpu.memory_space<vmem>>, vector<8x1xf32>
    %c0_1 = arith.constant 0 : index
    %c0_2 = arith.constant 0 : index
    %1 = vector.load %arg4[%c0_1, %c0_2] : memref<1x128xf32, #tpu.memory_space<vmem>>, vector<1x128xf32>
    %2 = vector.broadcast %0 : vector<8x1xf32> to vector<8x128xf32>
    %3 = vector.broadcast %1 : vector<1x128xf32> to vector<8x128xf32>
    %4 = arith.mulf %2, %3 : vector<8x128xf32>
    %5 = math.sin %4 : vector<8x128xf32>
    %6 = arith.truncf %5 : vector<8x128xf32> to vector<8x128xbf16>
    %c0_3 = arith.constant 0 : index
    %c0_4 = arith.constant 0 : index
    %7 = vector.load %arg5[%c0_3, %c0_4] : memref<128x128xbf16, #tpu.memory_space<vmem>>, vector<128x128xbf16>
    %cst = arith.constant dense<0.000000e+00> : vector<8x128xf32>
    %8 = tpu.matmul %6, %7, %cst {dimension_numbers = #tpu.dot_dimension_numbers<[1], [0], [0], [1], [0, 0, 1, 1], [], []>} : vector<8x128xbf16>, vector<128x128xbf16>, vector<8x128xf32> -> vector<8x128xf32>
    %9 = math.cos %4 : vector<8x128xf32>
    %10 = arith.truncf %9 : vector<8x128xf32> to vector<8x128xbf16>
    %c0_5 = arith.constant 0 : index
    %c0_6 = arith.constant 0 : index
    %11 = vector.load %arg6[%c0_5, %c0_6] : memref<128x128xbf16, #tpu.memory_space<vmem>>, vector<128x128xbf16>
    %cst_7 = arith.constant dense<0.000000e+00> : vector<8x128xf32>
    %12 = tpu.matmul %10, %11, %cst_7 {dimension_numbers = #tpu.dot_dimension_numbers<[1], [0], [0], [1], [0, 0, 1, 1], [], []>} : vector<8x128xbf16>, vector<128x128xbf16>, vector<8x128xf32> -> vector<8x128xf32>
    %13 = arith.addf %8, %12 : vector<8x128xf32>
    %c0_8 = arith.constant 0 : index
    %c0_9 = arith.constant 0 : index
    %14 = vector.load %arg7[%c0_8, %c0_9] : memref<1x128xf32, #tpu.memory_space<vmem>>, vector<1x128xf32>
    %15 = vector.broadcast %14 : vector<1x128xf32> to vector<8x128xf32>
    %16 = arith.addf %13, %15 : vector<8x128xf32>
    %17 = arith.negf %16 : vector<8x128xf32>
    %18 = math.exp %17 : vector<8x128xf32>
    %cst_10 = arith.constant 1.000000e+00 : f32
    %19 = vector.broadcast %cst_10 : f32 to vector<8x128xf32>
    %20 = arith.addf %19, %18 : vector<8x128xf32>
    %21 = arith.divf %19, %20 : vector<8x128xf32>
    %22 = arith.mulf %16, %21 : vector<8x128xf32>
    %c0_11 = arith.constant 0 : index
    %c0_12 = arith.constant 0 : index
    %23 = vector.load %arg2[%c0_11, %c0_12] : memref<8x512xf32, #tpu.memory_space<vmem>>, vector<8x512xf32>
    %24 = arith.truncf %23 : vector<8x512xf32> to vector<8x512xbf16>
    %c0_13 = arith.constant 0 : index
    %c0_14 = arith.constant 0 : index
    %25 = vector.load %arg8[%c0_13, %c0_14] : memref<512x256xbf16, #tpu.memory_space<vmem>>, vector<512x256xbf16>
    %cst_15 = arith.constant dense<0.000000e+00> : vector<8x256xf32>
    %26 = tpu.matmul %24, %25, %cst_15 {dimension_numbers = #tpu.dot_dimension_numbers<[1], [0], [0], [1], [0, 0, 1, 1], [], []>} : vector<8x512xbf16>, vector<512x256xbf16>, vector<8x256xf32> -> vector<8x256xf32>
    %c0_16 = arith.constant 0 : index
    %c0_17 = arith.constant 0 : index
    %27 = vector.load %arg3[%c0_16, %c0_17] : memref<8x512xf32, #tpu.memory_space<vmem>>, vector<8x512xf32>
    %28 = arith.truncf %27 : vector<8x512xf32> to vector<8x512xbf16>
    %c0_18 = arith.constant 0 : index
    %c0_19 = arith.constant 0 : index
    %29 = vector.load %arg9[%c0_18, %c0_19] : memref<512x256xbf16, #tpu.memory_space<vmem>>, vector<512x256xbf16>
    %cst_20 = arith.constant dense<0.000000e+00> : vector<8x256xf32>
    %30 = tpu.matmul %28, %29, %cst_20 {dimension_numbers = #tpu.dot_dimension_numbers<[1], [0], [0], [1], [0, 0, 1, 1], [], []>} : vector<8x512xbf16>, vector<512x256xbf16>, vector<8x256xf32> -> vector<8x256xf32>
    %31 = arith.addf %26, %30 : vector<8x256xf32>
    %32 = arith.truncf %22 : vector<8x128xf32> to vector<8x128xbf16>
    %c0_21 = arith.constant 0 : index
    %c0_22 = arith.constant 0 : index
    %33 = vector.load %arg10[%c0_21, %c0_22] : memref<128x256xbf16, #tpu.memory_space<vmem>>, vector<128x256xbf16>
    %cst_23 = arith.constant dense<0.000000e+00> : vector<8x256xf32>
    %34 = tpu.matmul %32, %33, %cst_23 {dimension_numbers = #tpu.dot_dimension_numbers<[1], [0], [0], [1], [0, 0, 1, 1], [], []>} : vector<8x128xbf16>, vector<128x256xbf16>, vector<8x256xf32> -> vector<8x256xf32>
    %35 = arith.addf %31, %34 : vector<8x256xf32>
    %c0_24 = arith.constant 0 : index
    %c0_25 = arith.constant 0 : index
    %36 = vector.load %arg11[%c0_24, %c0_25] : memref<1x256xf32, #tpu.memory_space<vmem>>, vector<1x256xf32>
    %37 = vector.broadcast %36 : vector<1x256xf32> to vector<8x256xf32>
    %38 = arith.addf %35, %37 : vector<8x256xf32>
    %cst_26 = arith.constant 0.000000e+00 : f32
    %39 = vector.broadcast %cst_26 : f32 to vector<8x256xf32>
    %40 = arith.maximumf %38, %39 : vector<8x256xf32>
    %41 = arith.truncf %40 : vector<8x256xf32> to vector<8x256xbf16>
    %c0_27 = arith.constant 0 : index
    %c0_28 = arith.constant 0 : index
    %c0_29 = arith.constant 0 : index
    %42 = vector.load %arg12[%c0_27, %c0_28, %c0_29] : memref<5x256x256xbf16, #tpu.memory_space<vmem>>, vector<1x256x256xbf16>
    %43 = vector.shape_cast %42 : vector<1x256x256xbf16> to vector<256x256xbf16>
    %cst_30 = arith.constant dense<0.000000e+00> : vector<8x256xf32>
    %44 = tpu.matmul %41, %43, %cst_30 {dimension_numbers = #tpu.dot_dimension_numbers<[1], [0], [0], [1], [0, 0, 1, 1], [], []>} : vector<8x256xbf16>, vector<256x256xbf16>, vector<8x256xf32> -> vector<8x256xf32>
    %c0_31 = arith.constant 0 : index
    %c0_32 = arith.constant 0 : index
    %c0_33 = arith.constant 0 : index
    %45 = vector.load %arg13[%c0_31, %c0_32, %c0_33] : memref<5x1x256xf32, #tpu.memory_space<vmem>>, vector<1x1x256xf32>
    %46 = vector.shape_cast %45 : vector<1x1x256xf32> to vector<1x256xf32>
    %47 = vector.broadcast %46 : vector<1x256xf32> to vector<8x256xf32>
    %48 = arith.addf %44, %47 : vector<8x256xf32>
    %cst_34 = arith.constant 0.000000e+00 : f32
    %49 = vector.broadcast %cst_34 : f32 to vector<8x256xf32>
    %50 = arith.maximumf %48, %49 : vector<8x256xf32>
    %51 = arith.truncf %50 : vector<8x256xf32> to vector<8x256xbf16>
    %c1 = arith.constant 1 : index
    %c0_35 = arith.constant 0 : index
    %c0_36 = arith.constant 0 : index
    %52 = vector.load %arg12[%c1, %c0_35, %c0_36] : memref<5x256x256xbf16, #tpu.memory_space<vmem>>, vector<1x256x256xbf16>
    %53 = vector.shape_cast %52 : vector<1x256x256xbf16> to vector<256x256xbf16>
    %cst_37 = arith.constant dense<0.000000e+00> : vector<8x256xf32>
    %54 = tpu.matmul %51, %53, %cst_37 {dimension_numbers = #tpu.dot_dimension_numbers<[1], [0], [0], [1], [0, 0, 1, 1], [], []>} : vector<8x256xbf16>, vector<256x256xbf16>, vector<8x256xf32> -> vector<8x256xf32>
    %c1_38 = arith.constant 1 : index
    %c0_39 = arith.constant 0 : index
    %c0_40 = arith.constant 0 : index
    %55 = vector.load %arg13[%c1_38, %c0_39, %c0_40] : memref<5x1x256xf32, #tpu.memory_space<vmem>>, vector<1x1x256xf32>
    %56 = vector.shape_cast %55 : vector<1x1x256xf32> to vector<1x256xf32>
    %57 = vector.broadcast %56 : vector<1x256xf32> to vector<8x256xf32>
    %58 = arith.addf %54, %57 : vector<8x256xf32>
    %cst_41 = arith.constant 0.000000e+00 : f32
    %59 = vector.broadcast %cst_41 : f32 to vector<8x256xf32>
    %60 = arith.maximumf %58, %59 : vector<8x256xf32>
    %61 = arith.truncf %60 : vector<8x256xf32> to vector<8x256xbf16>
    %c2 = arith.constant 2 : index
    %c0_42 = arith.constant 0 : index
    %c0_43 = arith.constant 0 : index
    %62 = vector.load %arg12[%c2, %c0_42, %c0_43] : memref<5x256x256xbf16, #tpu.memory_space<vmem>>, vector<1x256x256xbf16>
    %63 = vector.shape_cast %62 : vector<1x256x256xbf16> to vector<256x256xbf16>
    %cst_44 = arith.constant dense<0.000000e+00> : vector<8x256xf32>
    %64 = tpu.matmul %61, %63, %cst_44 {dimension_numbers = #tpu.dot_dimension_numbers<[1], [0], [0], [1], [0, 0, 1, 1], [], []>} : vector<8x256xbf16>, vector<256x256xbf16>, vector<8x256xf32> -> vector<8x256xf32>
    %c2_45 = arith.constant 2 : index
    %c0_46 = arith.constant 0 : index
    %c0_47 = arith.constant 0 : index
    %65 = vector.load %arg13[%c2_45, %c0_46, %c0_47] : memref<5x1x256xf32, #tpu.memory_space<vmem>>, vector<1x1x256xf32>
    %66 = vector.shape_cast %65 : vector<1x1x256xf32> to vector<1x256xf32>
    %67 = vector.broadcast %66 : vector<1x256xf32> to vector<8x256xf32>
    %68 = arith.addf %64, %67 : vector<8x256xf32>
    %cst_48 = arith.constant 0.000000e+00 : f32
    %69 = vector.broadcast %cst_48 : f32 to vector<8x256xf32>
    %70 = arith.maximumf %68, %69 : vector<8x256xf32>
    %71 = arith.truncf %70 : vector<8x256xf32> to vector<8x256xbf16>
    %c3 = arith.constant 3 : index
    %c0_49 = arith.constant 0 : index
    %c0_50 = arith.constant 0 : index
    %72 = vector.load %arg12[%c3, %c0_49, %c0_50] : memref<5x256x256xbf16, #tpu.memory_space<vmem>>, vector<1x256x256xbf16>
    %73 = vector.shape_cast %72 : vector<1x256x256xbf16> to vector<256x256xbf16>
    %cst_51 = arith.constant dense<0.000000e+00> : vector<8x256xf32>
    %74 = tpu.matmul %71, %73, %cst_51 {dimension_numbers = #tpu.dot_dimension_numbers<[1], [0], [0], [1], [0, 0, 1, 1], [], []>} : vector<8x256xbf16>, vector<256x256xbf16>, vector<8x256xf32> -> vector<8x256xf32>
    %c3_52 = arith.constant 3 : index
    %c0_53 = arith.constant 0 : index
    %c0_54 = arith.constant 0 : index
    %75 = vector.load %arg13[%c3_52, %c0_53, %c0_54] : memref<5x1x256xf32, #tpu.memory_space<vmem>>, vector<1x1x256xf32>
    %76 = vector.shape_cast %75 : vector<1x1x256xf32> to vector<1x256xf32>
    %77 = vector.broadcast %76 : vector<1x256xf32> to vector<8x256xf32>
    %78 = arith.addf %74, %77 : vector<8x256xf32>
    %cst_55 = arith.constant 0.000000e+00 : f32
    %79 = vector.broadcast %cst_55 : f32 to vector<8x256xf32>
    %80 = arith.maximumf %78, %79 : vector<8x256xf32>
    %81 = arith.truncf %80 : vector<8x256xf32> to vector<8x256xbf16>
    %c4 = arith.constant 4 : index
    %c0_56 = arith.constant 0 : index
    %c0_57 = arith.constant 0 : index
    %82 = vector.load %arg12[%c4, %c0_56, %c0_57] : memref<5x256x256xbf16, #tpu.memory_space<vmem>>, vector<1x256x256xbf16>
    %83 = vector.shape_cast %82 : vector<1x256x256xbf16> to vector<256x256xbf16>
    %cst_58 = arith.constant dense<0.000000e+00> : vector<8x256xf32>
    %84 = tpu.matmul %81, %83, %cst_58 {dimension_numbers = #tpu.dot_dimension_numbers<[1], [0], [0], [1], [0, 0, 1, 1], [], []>} : vector<8x256xbf16>, vector<256x256xbf16>, vector<8x256xf32> -> vector<8x256xf32>
    %c4_59 = arith.constant 4 : index
    %c0_60 = arith.constant 0 : index
    %c0_61 = arith.constant 0 : index
    %85 = vector.load %arg13[%c4_59, %c0_60, %c0_61] : memref<5x1x256xf32, #tpu.memory_space<vmem>>, vector<1x1x256xf32>
    %86 = vector.shape_cast %85 : vector<1x1x256xf32> to vector<1x256xf32>
    %87 = vector.broadcast %86 : vector<1x256xf32> to vector<8x256xf32>
    %88 = arith.addf %84, %87 : vector<8x256xf32>
    %cst_62 = arith.constant 0.000000e+00 : f32
    %89 = vector.broadcast %cst_62 : f32 to vector<8x256xf32>
    %90 = arith.maximumf %88, %89 : vector<8x256xf32>
    %91 = arith.truncf %90 : vector<8x256xf32> to vector<8x256xbf16>
    %c0_63 = arith.constant 0 : index
    %c0_64 = arith.constant 0 : index
    %92 = vector.load %arg14[%c0_63, %c0_64] : memref<256x512xbf16, #tpu.memory_space<vmem>>, vector<256x512xbf16>
    %cst_65 = arith.constant dense<0.000000e+00> : vector<8x512xf32>
    %93 = tpu.matmul %91, %92, %cst_65 {dimension_numbers = #tpu.dot_dimension_numbers<[1], [0], [0], [1], [0, 0, 1, 1], [], []>} : vector<8x256xbf16>, vector<256x512xbf16>, vector<8x512xf32> -> vector<8x512xf32>
    %c0_66 = arith.constant 0 : index
    %c0_67 = arith.constant 0 : index
    %94 = vector.load %arg15[%c0_66, %c0_67] : memref<1x512xf32, #tpu.memory_space<vmem>>, vector<1x512xf32>
    %95 = vector.broadcast %94 : vector<1x512xf32> to vector<8x512xf32>
    %96 = arith.addf %93, %95 : vector<8x512xf32>
    %cst_68 = arith.constant 6.43775177 : f32
    %97 = vector.broadcast %cst_68 : f32 to vector<8x1xf32>
    %98 = arith.mulf %97, %0 : vector<8x1xf32>
    %99 = math.exp %98 : vector<8x1xf32>
    %cst_69 = arith.constant 1.000000e+00 : f32
    %100 = vector.broadcast %cst_69 : f32 to vector<8x1xf32>
    %101 = arith.subf %99, %100 : vector<8x1xf32>
    %cst_70 = arith.constant 0.155333728 : f32
    %102 = vector.broadcast %cst_70 : f32 to vector<8x1xf32>
    %103 = arith.mulf %101, %102 : vector<8x1xf32>
    %104 = math.sqrt %103 : vector<8x1xf32>
    %105 = tpu.reciprocal %104 {approx = true} : vector<8x1xf32> -> vector<8x1xf32>
    %106 = vector.broadcast %105 : vector<8x1xf32> to vector<8x512xf32>
    %107 = arith.mulf %96, %106 : vector<8x512xf32>
    %c0_71 = arith.constant 0 : index
    %c0_72 = arith.constant 0 : index
    %108 = vector.load %arg16[%c0_71, %c0_72] : memref<8x512xf32, #tpu.memory_space<vmem>>, vector<8x512xf32>
    tpu.vector_store %arg16[%c0_71, %c0_72], %107 {strides = array<i32>} : memref<8x512xf32, #tpu.memory_space<vmem>>, vector<8x512xf32>,
    return
  }
  func.func @transform_0(%arg0: i32) -> (i32, i32) {
    %c0_i32 = arith.constant 0 : i32
    %c0_i32_0 = arith.constant 0 : i32
    return %arg0, %c0_i32 : i32, i32
  }
  func.func @transform_1(%arg0: i32) -> (i32, i32) {
    %c0_i32 = arith.constant 0 : i32
    %c0_i32_0 = arith.constant 0 : i32
    return %arg0, %c0_i32 : i32, i32
  }
  func.func @transform_2(%arg0: i32) -> (i32, i32) {
    %c0_i32 = arith.constant 0 : i32
    %c0_i32_0 = arith.constant 0 : i32
    return %arg0, %c0_i32 : i32, i32
  }
  func.func @transform_3(%arg0: i32) -> (i32, i32) {
    %c0_i32 = arith.constant 0 : i32
    %c0_i32_0 = arith.constant 0 : i32
    %c0_i32_1 = arith.constant 0 : i32
    return %c0_i32, %c0_i32_0 : i32, i32
  }
  func.func @transform_4(%arg0: i32) -> (i32, i32) {
    %c0_i32 = arith.constant 0 : i32
    %c0_i32_0 = arith.constant 0 : i32
    %c0_i32_1 = arith.constant 0 : i32
    return %c0_i32, %c0_i32_0 : i32, i32
  }
  func.func @transform_5(%arg0: i32) -> (i32, i32) {
    %c0_i32 = arith.constant 0 : i32
    %c0_i32_0 = arith.constant 0 : i32
    %c0_i32_1 = arith.constant 0 : i32
    return %c0_i32, %c0_i32_0 : i32, i32
  }
  func.func @transform_6(%arg0: i32) -> (i32, i32) {
    %c0_i32 = arith.constant 0 : i32
    %c0_i32_0 = arith.constant 0 : i32
    %c0_i32_1 = arith.constant 0 : i32
    return %c0_i32, %c0_i32_0 : i32, i32
  }
  func.func @transform_7(%arg0: i32) -> (i32, i32) {
    %c0_i32 = arith.constant 0 : i32
    %c0_i32_0 = arith.constant 0 : i32
    %c0_i32_1 = arith.constant 0 : i32
    return %c0_i32, %c0_i32_0 : i32, i32
  }
  func.func @transform_8(%arg0: i32) -> (i32, i32) {
    %c0_i32 = arith.constant 0 : i32
    %c0_i32_0 = arith.constant 0 : i32
    %c0_i32_1 = arith.constant 0 : i32
    return %c0_i32, %c0_i32_0 : i32, i32
  }
  func.func @transform_9(%arg0: i32) -> (i32, i32) {
    %c0_i32 = arith.constant 0 : i32
    %c0_i32_0 = arith.constant 0 : i32
    %c0_i32_1 = arith.constant 0 : i32
    return %c0_i32, %c0_i32_0 : i32, i32
  }
  func.func @transform_10(%arg0: i32) -> (i32, i32) {
    %c0_i32 = arith.constant 0 : i32
    %c0_i32_0 = arith.constant 0 : i32
    %c0_i32_1 = arith.constant 0 : i32
    return %c0_i32, %c0_i32_0 : i32, i32
  }
  func.func @transform_11(%arg0: i32) -> (i32, i32, i32) {
    %c0_i32 = arith.constant 0 : i32
    %c0_i32_0 = arith.constant 0 : i32
    %c0_i32_1 = arith.constant 0 : i32
    %c0_i32_2 = arith.constant 0 : i32
    return %c0_i32, %c0_i32_0, %c0_i32_1 : i32, i32, i32
  }
  func.func @transform_12(%arg0: i32) -> (i32, i32, i32) {
    %c0_i32 = arith.constant 0 : i32
    %c0_i32_0 = arith.constant 0 : i32
    %c0_i32_1 = arith.constant 0 : i32
    %c0_i32_2 = arith.constant 0 : i32
    return %c0_i32, %c0_i32_0, %c0_i32_1 : i32, i32, i32
  }
  func.func @transform_13(%arg0: i32) -> (i32, i32) {
    %c0_i32 = arith.constant 0 : i32
    %c0_i32_0 = arith.constant 0 : i32
    %c0_i32_1 = arith.constant 0 : i32
    return %c0_i32, %c0_i32_0 : i32, i32
  }
  func.func @transform_14(%arg0: i32) -> (i32, i32) {
    %c0_i32 = arith.constant 0 : i32
    %c0_i32_0 = arith.constant 0 : i32
    %c0_i32_1 = arith.constant 0 : i32
    return %c0_i32, %c0_i32_0 : i32, i32
  }
  func.func @transform_15(%arg0: i32) -> (i32, i32) {
    %c0_i32 = arith.constant 0 : i32
    %c0_i32_0 = arith.constant 0 : i32
    return %arg0, %c0_i32 : i32, i32
  }
}

</mosaic_0001>

<bundles_post_ra>
// kernel: tpu_custom_call.1
= control target key start
LH: loop header
LB: loop body
LE: loop exit
PB: predicated region body
PF: predicated region fallthrough
CT: control target
= control target key end

     0   :  { %20 = vsyncpa [#allocation3], 0  ;;  %s5157_s0 = inlined_call_operand.vmem [shape: f32[8,1], index: 0, kind: input, shape index: {}]   ;;  %s5158_s1 = inlined_call_operand.hbm [shape: f32[8,512], index: 1, kind: input, shape index: {}]   ;;  %s5159_s2 = inlined_call_operand.hbm [shape: f32[8,512], index: 2, kind: input, shape index: {}]   ;;  %s5160_s3 = inlined_call_operand.vmem [shape: f32[1,128], index: 3, kind: input, shape index: {}]   ;;  %s5161_s4 = inlined_call_operand.hbm [shape: bf16[128,128], index: 4, kind: input, shape index: {}]   ;;  %s5162_s5 = inlined_call_operand.hbm [shape: bf16[128,128], index: 5, kind: input, shape index: {}]   ;;  %s5163_s6 = inlined_call_operand.vmem [shape: f32[1,128], index: 6, kind: input, shape index: {}]   ;;  %s5164_s7 = inlined_call_operand.hbm [shape: bf16[512,256], index: 7, kind: input, shape index: {}]   ;;  %s5165_s8 = inlined_call_operand.hbm [shape: bf16[512,256], index: 8, kind: input, shape index: {}]   ;;  %s5166_s9 = inlined_call_operand.hbm [shape: bf16[128,256], index: 9, kind: input, shape index: {}]   ;;  %s5167_s10 = inlined_call_operand.vmem [shape: f32[1,256], index: 10, kind: input, shape index: {}]   ;;  %s5168_s11 = inlined_call_operand.hbm [shape: bf16[5,256,256], index: 11, kind: input, shape index: {}]   ;;  %s5169_s12 = inlined_call_operand.vmem [shape: f32[5,1,256], index: 12, kind: input, shape index: {}]   ;;  %s5170_s13 = inlined_call_operand.hbm [shape: bf16[256,512], index: 13, kind: input, shape index: {}]   ;;  %s5171_s14 = inlined_call_operand.vmem [shape: f32[1,512], index: 14, kind: input, shape index: {}]   ;;  %s5172_s15 = inlined_call_operand.hbm [shape: f32[8,512], index: 15, kind: output, shape index: {}]  }
   0x1   :  { %21 = vsyncpa [#allocation6], 0 }
   0x2   :  { %22 = vsyncpa [#allocation9], 0 }
   0x3   :  { %23 = vsyncpa [#allocation12], 0 }
   0x4   :  { %24 = vsyncpa [#allocation15], 0 }
   0x5   :  { %25 = vsyncpa [#allocation4], 0  ;;  %s4810_s18 = smov [#allocation5]   ;;  %s4578_s22 = scalar_lea.hbm %s5159_s2, 512 }
   0x6   :  { %s44_s19 = sshll.u32 %s4810_s18, 4  ;;  %p4579_p0 = scmp.ne.s32.totalorder %s5159_s2, %s4578_s22  ;;  %s45_s19 = int_to_ptr.vmem [resolvable:$true] %s44_s19 }
   0x7   :  { %p4582_p1 = scmp.lt.u32.totalorder %s4578_s22, %s5159_s2 }
   0x9   :  { %p4584_p2 = pnand %p4582_p1, %p4579_p0 }
   0xb   :  { %4587 = shalt.err (!%p4584_p2)
}
   0xc   :  { %s4588_s27 = scalar_lea.vmem %s45_s19, 512  ;;  %p4593_p4 = scmp.lt.s32.totalorder %s45_s19, %s45_s19 }
   0xd   :  { %p4589_p3 = scmp.ne.s32.totalorder %s45_s19, %s4588_s27  ;;  %p4594_p5 = scmp.lt.s32.totalorder %s4588_s27, %s4588_s27 }
   0xf   :  { %p4595_p6 = por %p4594_p5, %p4593_p4 }
  0x11   :  { %p4596_p7 = pnand %p4595_p6, %p4589_p3 }
  0x13   :  { %4599 = shalt.err (!%p4596_p7)
}
  0x14   :  { %47 = dma.hbm_to_vmem [thread:$0]  %s5159_s2, 512, %s45_s19, [#allocation6]  }
  0x15   :  { %s4811_s30 = smov [#allocation8]   ;;  %s4600_s20 = scalar_lea.hbm %s5162_s5, 1024 }
  0x16   :  { %s67_s16 = sshll.u32 %s4811_s30, 4  ;;  %p4601_p8 = scmp.ne.s32.totalorder %s5162_s5, %s4600_s20  ;;  %s68_s16 = int_to_ptr.vmem [resolvable:$true] %s67_s16 }
  0x17   :  { %p4604_p9 = scmp.lt.u32.totalorder %s4600_s20, %s5162_s5 }
  0x19   :  { %p4606_p10 = pnand %p4604_p9, %p4601_p8 }
  0x1b   :  { %4609 = shalt.err (!%p4606_p10)
}
  0x1c   :  { %s4610_s25 = scalar_lea.vmem %s68_s16, 1024  ;;  %p4615_p12 = scmp.lt.s32.totalorder %s68_s16, %s68_s16 }
  0x1d   :  { %p4611_p11 = scmp.ne.s32.totalorder %s68_s16, %s4610_s25  ;;  %p4616_p13 = scmp.lt.s32.totalorder %s4610_s25, %s4610_s25 }
  0x1f   :  { %p4617_p0 = por %p4616_p13, %p4615_p12 }
  0x21   :  { %p4618_p1 = pnand %p4617_p0, %p4611_p11 }
  0x23   :  { %4621 = shalt.err (!%p4618_p1)
}
  0x24   :  { %s4812_s2 = smov 64   ;;  %s4813_s19 = smov 4  }
  0x25   :  { %73 = dma.hbm_to_vmem [thread:$0]  %s5162_s5, 1024, %s68_s16, [#allocation9], %s4812_s2, %s4812_s2, %s4813_s19  }
  0x26   :  { %s4814_s28 = smov [#allocation11]   ;;  %s4815_s30 = smov [#allocation14]  }
  0x27   :  { %s93_s29 = sshll.u32 %s4814_s28, 4  ;;  %s119_s17 = sshll.u32 %s4815_s30, 4  ;;  %s94_s29 = int_to_ptr.vmem [resolvable:$true] %s93_s29  ;;  %s4942_s17 = int_to_ptr.vmem [resolvable:$true] %s119_s17 }
  0x28   :  { %s4622_s21 = scalar_lea.hbm %s5165_s8, 8192 }
  0x29   :  { %p4623_p2 = scmp.ne.s32.totalorder %s5165_s8, %s4622_s21  ;;  %p4626_p3 = scmp.lt.u32.totalorder %s4622_s21, %s5165_s8 }
  0x2b   :  { %p4628_p4 = pnand %p4626_p3, %p4623_p2 }
  0x2d   :  { %4631 = shalt.err (!%p4628_p4)
}
  0x2e   :  { %s4632_s5 = scalar_lea.vmem %s94_s29, 8192  ;;  %p4637_p6 = scmp.lt.s32.totalorder %s94_s29, %s94_s29 }
  0x2f   :  { %p4633_p5 = scmp.ne.s32.totalorder %s94_s29, %s4632_s5  ;;  %p4638_p7 = scmp.lt.s32.totalorder %s4632_s5, %s4632_s5 }
  0x31   :  { %p4639_p8 = por %p4638_p7, %p4637_p6 }
  0x33   :  { %p4640_p9 = pnand %p4639_p8, %p4633_p5 }
  0x35   :  { %4643 = shalt.err (!%p4640_p9)
}
  0x36   :  { %s4816_s16 = smov 128   ;;  %s4817_s26 = smov 8  }
  0x37   :  { %99 = dma.hbm_to_vmem [thread:$0]  %s5165_s8, 8192, %s94_s29, [#allocation12], %s4816_s16, %s4816_s16, %s4817_s26  }
  0x38   :  { %s4644_s20 = scalar_lea.hbm %s5168_s11, 20480 }
  0x39   :  { %p4645_p10 = scmp.ne.s32.totalorder %s5168_s11, %s4644_s20  ;;  %p4648_p11 = scmp.lt.u32.totalorder %s4644_s20, %s5168_s11 }
  0x3b   :  { %p4650_p12 = pnand %p4648_p11, %p4645_p10 }
  0x3d   :  { %4653 = shalt.err (!%p4650_p12)
}
  0x3e   :  { %s4654_s25 = scalar_lea.vmem %s4942_s17, 20480  ;;  %p4659_p0 = scmp.lt.s32.totalorder %s4942_s17, %s4942_s17 }
  0x3f   :  { %p4655_p13 = scmp.ne.s32.totalorder %s4942_s17, %s4654_s25  ;;  %p4660_p1 = scmp.lt.s32.totalorder %s4654_s25, %s4654_s25 }
  0x41   :  { %p4661_p2 = por %p4660_p1, %p4659_p0 }
  0x43   :  { %p4662_p3 = pnand %p4661_p2, %p4655_p13 }
  0x45   :  { %4665 = shalt.err (!%p4662_p3)
}
  0x46   :  { %125 = dma.hbm_to_vmem [thread:$0]  %s5168_s11, 20480, %s4942_s17, [#allocation15], %s4816_s16, %s4816_s16, %s4817_s26  }
  0x47   :  { %s4818_s5 = smov [#allocation2]   ;;  %s4819_s28 = smov [#allocation7]  }
  0x48   :  { %s34_s27 = sshll.u32 %s4818_s5, 4  ;;  %s55_s30 = sshll.u32 %s4819_s28, 4  ;;  %s35_s27 = int_to_ptr.vmem [resolvable:$true] %s34_s27  ;;  %s4979_s30 = int_to_ptr.vmem [resolvable:$true] %s55_s30 }
  0x49   :  { %s4666_s21 = scalar_lea.hbm %s5158_s1, 512 }
  0x4a   :  { %p4667_p4 = scmp.ne.s32.totalorder %s5158_s1, %s4666_s21  ;;  %p4670_p5 = scmp.lt.u32.totalorder %s4666_s21, %s5158_s1 }
  0x4c   :  { %p4672_p6 = pnand %p4670_p5, %p4667_p4 }
  0x4e   :  { %4675 = shalt.err (!%p4672_p6)
}
  0x4f   :  { %s4676_s11 = scalar_lea.vmem %s35_s27, 512  ;;  %p4681_p8 = scmp.lt.s32.totalorder %s35_s27, %s35_s27 }
  0x50   :  { %p4677_p7 = scmp.ne.s32.totalorder %s35_s27, %s4676_s11  ;;  %p4682_p9 = scmp.lt.s32.totalorder %s4676_s11, %s4676_s11 }
  0x52   :  { %p4683_p10 = por %p4682_p9, %p4681_p8 }
  0x54   :  { %p4684_p11 = pnand %p4683_p10, %p4677_p7 }
  0x56   :  { %4687 = shalt.err (!%p4684_p11)
}
  0x57   :  { %37 = dma.hbm_to_vmem [thread:$0]  %s5158_s1, 512, %s35_s27, [#allocation3]  }
  0x58   :  { %s4688_s28 = scalar_lea.hbm %s5161_s4, 1024 }
  0x59   :  { %p4689_p12 = scmp.ne.s32.totalorder %s5161_s4, %s4688_s28  ;;  %p4692_p13 = scmp.lt.u32.totalorder %s4688_s28, %s5161_s4 }
  0x5b   :  { %p4694_p0 = pnand %p4692_p13, %p4689_p12 }
  0x5d   :  { %4697 = shalt.err (!%p4694_p0)
}
  0x5e   :  { %s4698_s23 = scalar_lea.vmem %s4979_s30, 1024  ;;  %p4703_p2 = scmp.lt.s32.totalorder %s4979_s30, %s4979_s30 }
  0x5f   :  { %p4699_p1 = scmp.ne.s32.totalorder %s4979_s30, %s4698_s23  ;;  %p4704_p3 = scmp.lt.s32.totalorder %s4698_s23, %s4698_s23 }
  0x61   :  { %p4705_p4 = por %p4704_p3, %p4703_p2 }
  0x63   :  { %p4706_p5 = pnand %p4705_p4, %p4699_p1 }
  0x65   :  { %4709 = shalt.err (!%p4706_p5)
}
  0x66   :  { %61 = dma.hbm_to_vmem [thread:$0]  %s5161_s4, 1024, %s4979_s30, [#allocation6], %s4812_s2, %s4812_s2, %s4813_s19  }
  0x67   :  { %s4820_s24 = smov [#allocation10]   ;;  %s4821_s11 = smov [#allocation13]  }
  0x68   :  { %s81_s25 = sshll.u32 %s4820_s24, 4  ;;  %s105_s17 = sshll.u32 %s4821_s11, 4  ;;  %s82_s25 = int_to_ptr.vmem [resolvable:$true] %s81_s25  ;;  %s5013_s17 = int_to_ptr.vmem [resolvable:$true] %s105_s17 }
  0x69   :  { %s4710_s5 = scalar_lea.hbm %s5164_s7, 8192 }
  0x6a   :  { %p4711_p6 = scmp.ne.s32.totalorder %s5164_s7, %s4710_s5  ;;  %p4714_p7 = scmp.lt.u32.totalorder %s4710_s5, %s5164_s7 }
  0x6c   :  { %p4716_p8 = pnand %p4714_p7, %p4711_p6 }
  0x6e   :  { %4719 = shalt.err (!%p4716_p8)
}
  0x6f   :  { %s4720_s4 = scalar_lea.vmem %s82_s25, 8192  ;;  %p4725_p10 = scmp.lt.s32.totalorder %s82_s25, %s82_s25 }
  0x70   :  { %p4721_p9 = scmp.ne.s32.totalorder %s82_s25, %s4720_s4  ;;  %p4726_p11 = scmp.lt.s32.totalorder %s4720_s4, %s4720_s4 }
  0x72   :  { %p4727_p12 = por %p4726_p11, %p4725_p10 }
  0x74   :  { %p4728_p13 = pnand %p4727_p12, %p4721_p9 }
  0x76   :  { %4731 = shalt.err (!%p4728_p13)
}
  0x77   :  { %87 = dma.hbm_to_vmem [thread:$0]  %s5164_s7, 8192, %s82_s25, [#allocation9], %s4816_s16, %s4816_s16, %s4817_s26  }
  0x78   :  { %s4732_s23 = scalar_lea.hbm %s5166_s9, 2048 }
  0x79   :  { %p4733_p0 = scmp.ne.s32.totalorder %s5166_s9, %s4732_s23  ;;  %p4736_p1 = scmp.lt.u32.totalorder %s4732_s23, %s5166_s9 }
  0x7b   :  { %p4738_p2 = pnand %p4736_p1, %p4733_p0 }
  0x7d   :  { %4741 = shalt.err (!%p4738_p2)
}
  0x7e   :  { %s4742_s8 = scalar_lea.vmem %s5013_s17, 2048  ;;  %p4747_p4 = scmp.lt.s32.totalorder %s5013_s17, %s5013_s17 }
  0x7f   :  { %p4743_p3 = scmp.ne.s32.totalorder %s5013_s17, %s4742_s8  ;;  %p4748_p5 = scmp.lt.s32.totalorder %s4742_s8, %s4742_s8 }
  0x81   :  { %p4749_p6 = por %p4748_p5, %p4747_p4 }
  0x83   :  { %p4750_p7 = pnand %p4749_p6, %p4743_p3 }
  0x85   :  { %4753 = shalt.err (!%p4750_p7)
}
  0x86   :  { %111 = dma.hbm_to_vmem [thread:$0]  %s5166_s9, 2048, %s5013_s17, [#allocation12], %s4816_s16, %s4816_s16, %s4817_s26  }
  0x87   :  { %s4822_s29 = smov [#allocation16]   ;;  %s4754_s20 = scalar_lea.hbm %s5170_s13, 8192 }
  0x88   :  { %s133_s5 = sshll.u32 %s4822_s29, 4  ;;  %p4755_p8 = scmp.ne.s32.totalorder %s5170_s13, %s4754_s20  ;;  %s134_s5 = int_to_ptr.vmem [resolvable:$true] %s133_s5 }
  0x89   :  { %p4758_p9 = scmp.lt.u32.totalorder %s4754_s20, %s5170_s13 }
  0x8b   :  { %p4760_p10 = pnand %p4758_p9, %p4755_p8 }
  0x8d   :  { %4763 = shalt.err (!%p4760_p10)
}
  0x8e   :  { %s4764_s30 = scalar_lea.vmem %s134_s5, 8192  ;;  %p4769_p12 = scmp.lt.s32.totalorder %s134_s5, %s134_s5 }
  0x8f   :  { %p4765_p11 = scmp.ne.s32.totalorder %s134_s5, %s4764_s30  ;;  %p4770_p13 = scmp.lt.s32.totalorder %s4764_s30, %s4764_s30 }
  0x91   :  { %p4771_p0 = por %p4770_p13, %p4769_p12 }
  0x93   :  { %p4772_p1 = pnand %p4771_p0, %p4765_p11 }
  0x95   :  { %4775 = shalt.err (!%p4772_p1)
}
  0x96   :  { %s4823_s9 = smov 256   ;;  %s4824_s16 = smov 16  }
  0x97   :  { %139 = dma.hbm_to_vmem [thread:$0]  %s5170_s13, 8192, %s134_s5, [#allocation15], %s4823_s9, %s4823_s9, %s4824_s16  }
  0x98   :  { %4798 = dma.done.wait [#allocation3], 512  }
  0x99   :  { %4799 = vsyncadd [#allocation3], 4294966784 }
  0x9a   :  { %4800 = dma.done.wait [#allocation6], 1536  }
  0x9b   :  { %4801 = vsyncadd [#allocation6], 4294965760 }
  0x9c   :  { %4802 = dma.done.wait [#allocation9], 9216  }
  0x9d   :  { %4803 = vsyncadd [#allocation9], 4294958080 }
  0x9e   :  { %4804 = dma.done.wait [#allocation12], 10240  }
  0x9f   :  { %4805 = vsyncadd [#allocation12], 4294957056 }
  0xa0   :  { %4806 = dma.done.wait [#allocation15], 28672  }
  0xa1   :  { %4807 = vsyncadd [#allocation15], 4294938624  ;;  %v4825_v0 = vmov 0   ;;  %v170_v1 = vld [vmem:[%s5157_s0] sm:$0xff]  ;;  %v3996_v13 = vld [vmem:[#allocation8] sm:$0xff]   ;;  %v4826_v15 = vmov 0.0  }
  0xa2   :  { %3995 = vset.pattern.permute.xlu0 %v4825_v0  ;;  %v3463_v2 = vmul.f32 6.437752, %v170_v1  ;;  %v3997_v14 = vld [vmem:[#allocation7] sm:$0xff]   ;;  %3926 = vmatprep.subr.bf16.mxu0 %v4826_v15  ;;  %v3998_v16 = vld [vmem:[#allocation8 + $0x8] sm:$0xff]   ;;  %v4000_v18 = vld [vmem:[#allocation8 + $0x10] sm:$0xff]   ;;  %vm4827_vm2 = vmmov 0  }
  0xa3   :  { %174 = vperm.xlu0 %3995, %v170_v1   ;;  %3946 = vmatprep.subr.bf16.mxu1 %v4826_v15  ;;  %v3999_v17 = vld [vmem:[#allocation7 + $0x8] sm:$0xff]   ;;  %v4001_v19 = vld [vmem:[#allocation7 + $0x10] sm:$0xff]   ;;  %v4002_v20 = vld [vmem:[#allocation8 + $0x18] sm:$0xff]   ;;  %v4828_v45 = vmov 683565275   ;;  %s4834_s21 = smov [#allocation17]  }
  0xa4   :  { %v3464_v3 = vmul.f32 1.442695, %v3463_v2  ;;  %3927 = vmatpush3.bf16.msra.mxu0 %v3996_v13  ;;  %3947 = vmatpush3.bf16.msra.mxu1 %v3997_v14  ;;  %v4003_v21 = vld [vmem:[#allocation7 + $0x18] sm:$0xff]   ;;  %v4004_v22 = vld [vmem:[#allocation8 + $0x20] sm:$0xff]   ;;  %v4006_v24 = vld [vmem:[#allocation8 + $0x28] sm:$0xff]   ;;  %s3495_s4 = sshll.u32 %s4834_s21, 4  ;;  %s3496_s4 = int_to_ptr.vmem [resolvable:$true] %s3495_s4 }
  0xa5   :  { %3928 = vmatprep.subr.bf16.mxu0 %v4826_v15  ;;  %3948 = vmatprep.subr.bf16.mxu1 %v4826_v15  ;;  %v4005_v23 = vld [vmem:[#allocation7 + $0x20] sm:$0xff]   ;;  %v4007_v25 = vld [vmem:[#allocation7 + $0x28] sm:$0xff]   ;;  %v4008_v26 = vld [vmem:[#allocation8 + $0x30] sm:$0xff]   ;;  %v4829_v47 = vmov 2475754826   ;;  %p4781_p3 = scmp.lt.s32.totalorder %s3496_s4, %s3496_s4 }
  0xa6   :  { %4564 = vpow2.f32 %v3464_v3  ;;  %3942 = vmatprep.mubr.msk.bf16.mxu0 %vm4827_vm2, %v4826_v15  ;;  %3962 = vmatprep.mubr.msk.bf16.mxu1 %vm4827_vm2, %v4826_v15  ;;  %v4009_v27 = vld [vmem:[#allocation7 + $0x30] sm:$0xff]   ;;  %v4010_v28 = vld [vmem:[#allocation8 + $0x38] sm:$0xff]   ;;  %v4014_v30 = vld [vmem:[#allocation11 + $0x4] ss:$8 sps:$4 sm:$0xff]   ;;  %v4830_v50 = vmov 2131351028  }
  0xa7   :  { %v4011_v29 = vld [vmem:[#allocation7 + $0x38] sm:$0xff]   ;;  %v4017_v31 = vld [vmem:[#allocation11 + $0x104] ss:$8 sps:$4 sm:$0xff]   ;;  %v3508_v32 = vld [vmem:[%s5160_s3] ss:$0 sm:$0xff] }
  0xa8   :  { %3929 = vmatpush3.bf16.msra.mxu0 %v3998_v16  ;;  %3949 = vmatpush3.bf16.msra.mxu1 %v3999_v17  ;;  %v4831_v53 = vmov 2102212464   ;;  %v4832_v56 = vmov 920167782   ;;  %v4833_v59 = vmov 1326507024  }
  0xa9   :  { %3930 = vmatprep.subr.bf16.mxu0 %v4826_v15  ;;  %3950 = vmatprep.subr.bf16.mxu1 %v4826_v15 }
  0xac   :  { %3931 = vmatpush3.bf16.msra.mxu0 %v4000_v18  ;;  %3951 = vmatpush3.bf16.msra.mxu1 %v4001_v19 }
  0xad   :  { %3932 = vmatprep.subr.bf16.mxu0 %v4826_v15  ;;  %3952 = vmatprep.subr.bf16.mxu1 %v4826_v15 }
  0xb0   :  { %v4565_v4 = vpop.eup %4564  ;;  %3933 = vmatpush3.bf16.msra.mxu0 %v4002_v20  ;;  %3953 = vmatpush3.bf16.msra.mxu1 %v4003_v21 }
  0xb1   :  { %v3907_v5 = vadd.f32 -1.0, %v4565_v4  ;;  %3934 = vmatprep.subr.bf16.mxu0 %v4826_v15  ;;  %3954 = vmatprep.subr.bf16.mxu1 %v4826_v15 }
  0xb3   :  { %v3467_v6 = vmul.f32 0.15533373, %v3907_v5 }
  0xb4   :  { %3935 = vmatpush3.bf16.msra.mxu0 %v4004_v22  ;;  %3955 = vmatpush3.bf16.msra.mxu1 %v4005_v23 }
  0xb5   :  { %4566 = vrsqrt.f32 %v3467_v6  ;;  %vm3470_vm0 = vcmp.eq.f32.partialorder %v3467_v6, inf  ;;  %v3473_v8 = vand.u32 2147483648, %v3467_v6  ;;  %vm3472_vm1 = vcmp.eq.f32.partialorder %v3467_v6, 0.0  ;;  %3936 = vmatprep.subr.bf16.mxu0 %v4826_v15  ;;  %3956 = vmatprep.subr.bf16.mxu1 %v4826_v15 }
  0xb8   :  { %3937 = vmatpush3.bf16.msra.mxu0 %v4006_v24  ;;  %3957 = vmatpush3.bf16.msra.mxu1 %v4007_v25 }
  0xb9   :  { %3938 = vmatprep.subr.bf16.mxu0 %v4826_v15  ;;  %3958 = vmatprep.subr.bf16.mxu1 %v4826_v15 }
  0xbc   :  { %3939 = vmatpush3.bf16.msra.mxu0 %v4008_v26  ;;  %3959 = vmatpush3.bf16.msra.mxu1 %v4009_v27 }
  0xbd   :  { %3940 = vmatprep.subr.bf16.mxu0 %v4826_v15  ;;  %3960 = vmatprep.subr.bf16.mxu1 %v4826_v15 }
  0xbf   :  { %v4567_v7 = vpop.eup %4566 }
  0xc0   :  { %v3469_v9 = vmul.f32 %v4567_v7, %v3467_v6  ;;  %3941 = vmatpush3.bf16.msra.mxu0 %v4010_v28  ;;  %3961 = vmatpush3.bf16.msra.mxu1 %v4011_v29 }
  0xc1   :  { %1080 = vmatprep.subr.bf16.mxu0 %v4014_v30  ;;  %1121 = vmatprep.subr.bf16.mxu1 %v4017_v31 }
  0xc2   :  { %v3471_v10 = vsel %vm3470_vm0, %v3467_v6, %v3469_v9 }
  0xc3   :  { %v3474_v11 = vsel %vm3472_vm1, %v3473_v8, %v3471_v10 }
  0xc4   :  { %4568 = vrcp.f32 %v3474_v11 }
  0xce   :  { %v4569_v12 = vpop.eup %4568 }
  0xcf   :  { %3478 = vperm.xlu0 %3995, %v4569_v12  }
 0x122   :  { %v175_v33 = vpop.permute.xlu0 %174 }
 0x123   :  { %v5069_v34 = vmul.f32 %v3508_v32, %v175_v33 }
 0x125   :  { %v187_v35 = vand.u32 2139095040, %v5069_v34  ;;  %v184_v39 = vand.u32 2147483647, %v5069_v34  ;;  %vm186_vm10 = vcmp.lt.s32.totalorder %v5069_v34, 0  ;;  %vm276_vm2 = vweird.f32 %v5069_v34 }
 0x127   :  { %v188_v36 = vshrl.u32 %v187_v35, 23  ;;  %v191_v42 = vand.u32 8388607, %v184_v39  ;;  %vm185_vm11 = vcmp.le.f32.partialorder %v184_v39, 0.7853982 }
 0x129   :  { %v3509_v37 = vadd.s32 4294967169, %v188_v36  ;;  %v192_v61 = vor.u32 8388608, %v191_v42 }
 0x12b   :  { %v194_v38 = vadd.s32 1, %v3509_v37  ;;  %v232_v12 = vshll.u32 %v192_v61, 8 }
 0x12d   :  { %vm195_vm3 = vcmp.gt.s32.totalorder %v194_v38, 0 }
 0x12e   :  { %v196_v40 = vsel %vm195_vm3, %v194_v38, 0 }
 0x12f   :  { %v198_v41 = vand.u32 31, %v196_v40  ;;  %v197_v44 = vshrl.u32 %v196_v40, 5 }
 0x131   :  { %v199_v43 = vsub.s32 32, %v198_v41  ;;  %v201_v46 = vshll.u32 %v4828_v45, %v198_v41  ;;  %v204_v48 = vshll.u32 %v4829_v47, %v198_v41  ;;  %v207_v52 = vshll.u32 %v4830_v50, %v198_v41 }
 0x132   :  { %v210_v55 = vshll.u32 %v4831_v53, %v198_v41  ;;  %v213_v58 = vshll.u32 %v4832_v56, %v198_v41  ;;  %vm216_vm4 = vcmp.lt.s32.totalorder %v197_v44, 1  ;;  %vm219_vm5 = vcmp.lt.s32.totalorder %v197_v44, 4 }
 0x133   :  { %v202_v49 = vshrl.u32 %v4829_v47, %v199_v43  ;;  %v205_v51 = vshrl.u32 %v4830_v50, %v199_v43  ;;  %v208_v54 = vshrl.u32 %v4831_v53, %v199_v43  ;;  %v211_v57 = vshrl.u32 %v4832_v56, %v199_v43 }
 0x134   :  { %v214_v60 = vshrl.u32 %v4833_v59, %v199_v43  ;;  %v200_v7 = vshrl.u32 %v4828_v45, %v199_v43  ;;  %vm218_vm6 = vcmp.lt.s32.totalorder %v197_v44, 3  ;;  %vm217_vm7 = vcmp.lt.s32.totalorder %v197_v44, 2 }
 0x135   :  { %v203_v62 = vor.u32 %v202_v49, %v201_v46  ;;  %v206_v63 = vor.u32 %v205_v51, %v204_v48  ;;  %v209_v1 = vor.u32 %v208_v54, %v207_v52  ;;  %v212_v2 = vor.u32 %v211_v57, %v210_v55 }
 0x136   :  { %v215_v3 = vor.u32 %v214_v60, %v213_v58 }
 0x137   :  { %v221_v4 = vsel %vm219_vm5, %v209_v1, 2102212464  ;;  %v224_v5 = vsel %vm216_vm4, %v203_v62, %v206_v63  ;;  %v228_v6 = vsel %vm216_vm4, %v206_v63, %v209_v1  ;;  %v225_v8 = vsel %vm219_vm5, %v212_v2, 920167782 }
 0x138   :  { %v229_v9 = vsel %vm219_vm5, %v215_v3, 1326507024  ;;  %v226_v10 = vsel %vm218_vm6, %v209_v1, %v225_v8  ;;  %v220_v13 = vsel %vm216_vm4, %v200_v7, %v203_v62  ;;  %v222_v14 = vsel %vm218_vm6, %v206_v63, %v221_v4  ;;  %v689_v4 = vld [vmem:[#allocation5 + $0x8] sm:$0xff] }
 0x139   :  { %v230_v11 = vsel %vm218_vm6, %v212_v2, %v229_v9  ;;  %v227_v15 = vsel %vm217_vm7, %v224_v5, %v226_v10  ;;  %v223_v21 = vsel %vm217_vm7, %v220_v13, %v222_v14  ;;  %v691_v5 = vld [vmem:[#allocation5 + $0x18] sm:$0xff]  ;;  %v4012_v8 = vld [vmem:[#allocation11] ss:$8 sps:$4 sm:$0xff]   ;;  %v693_v14 = vpack.c.bf16 %v689_v4, %v689_v4  ;;  %v4101_v4 = vld [vmem:[#allocation11 + $0x1e4] ss:$8 sps:$4 sm:$0xff]  }
 0x13a   :  { %v231_v16 = vsel %vm217_vm7, %v228_v6, %v230_v11  ;;  %v5078_v19 = vmul.u32.u64.low %v232_v12, %v227_v15  ;;  %v5079_v20 = vmul.u32.u64.high %v232_v12, %v227_v15, %v5078_v19  ;;  %v239_v23 = vmul.u32 %v232_v12, %v223_v21  ;;  %v4015_v9 = vld [vmem:[#allocation11 + $0x100] ss:$8 sps:$4 sm:$0xff]   ;;  %v4023_v13 = vld [vmem:[#allocation11 + $0x114] ss:$8 sps:$4 sm:$0xff]  }
 0x13b   :  { %v5075_v17 = vmul.u32.u64.low %v232_v12, %v231_v16  ;;  %v5076_v18 = vmul.u32.u64.high %v232_v12, %v231_v16, %v5075_v17  ;;  %v4020_v12 = vld [vmem:[#allocation11 + $0x14] ss:$8 sps:$4 sm:$0xff]   ;;  %v695_v15 = vpack.c.bf16 %v691_v5, %v691_v5  ;;  %v4018_v16 = vld [vmem:[#allocation11 + $0x10] ss:$8 sps:$4 sm:$0xff]   ;;  %v4096_v5 = vld [vmem:[#allocation11 + $0xe0] ss:$8 sps:$4 sm:$0xff]  }
 0x13c   :  { %v242_v22 = vadd.s32 1, %v5079_v20  ;;  %v4026_v17 = vld [vmem:[#allocation11 + $0x24] ss:$8 sps:$4 sm:$0xff]   ;;  %v4032_v21 = vld [vmem:[#allocation11 + $0x34] ss:$8 sps:$4 sm:$0xff]  }
 0x13d   :  { %vm241_vm8 = vc.u32 %v5076_v18, %v5078_v19  ;;  %v240_v36 = vadd.s32 %v5078_v19, %v5076_v18  ;;  %v4029_v18 = vld [vmem:[#allocation11 + $0x124] ss:$8 sps:$4 sm:$0xff]   ;;  %v4024_v19 = vld [vmem:[#allocation11 + $0x20] ss:$8 sps:$4 sm:$0xff]  }
 0x13e   :  { %v243_v24 = vsel %vm241_vm8, %v242_v22, %v5079_v20  ;;  %v4027_v20 = vld [vmem:[#allocation11 + $0x120] ss:$8 sps:$4 sm:$0xff]   ;;  %v4035_v22 = vld [vmem:[#allocation11 + $0x134] ss:$8 sps:$4 sm:$0xff]  }
 0x13f   :  { %v244_v25 = vadd.s32 %v243_v24, %v239_v23  ;;  %v4030_v23 = vld [vmem:[#allocation11 + $0x30] ss:$8 sps:$4 sm:$0xff]  }
 0x140   :  { %v4033_v24 = vld [vmem:[#allocation11 + $0x130] ss:$8 sps:$4 sm:$0xff]  }
 0x141   :  { %v245_v26 = vadd.s32 536870912, %v244_v25 }
 0x143   :  { %v246_v27 = vshrl.u32 %v245_v26, 30  ;;  %v4041_v26 = vld [vmem:[#allocation11 + $0x144] ss:$8 sps:$4 sm:$0xff]  }
 0x145   :  { %v247_v28 = vshll.u32 %v246_v27, 30  ;;  %v270_v49 = vsub.s32 4, %v246_v27 }
 0x147   :  { %v248_v29 = vsub.s32 %v244_v25, %v247_v28  ;;  %v271_v52 = vsel %vm186_vm10, %v270_v49, %v246_v27  ;;  %v4038_v25 = vld [vmem:[#allocation11 + $0x44] ss:$8 sps:$4 sm:$0xff]   ;;  %v4036_v27 = vld [vmem:[#allocation11 + $0x40] ss:$8 sps:$4 sm:$0xff]   ;;  %v4066_v49 = vld [vmem:[#allocation11 + $0x90] ss:$8 sps:$4 sm:$0xff]  }
 0x148   :  { %v273_v54 = vsel %vm185_vm11, 0, %v271_v52  ;;  %v4039_v28 = vld [vmem:[#allocation11 + $0x140] ss:$8 sps:$4 sm:$0xff]   ;;  %v4077_v52 = vld [vmem:[#allocation11 + $0x1a4] ss:$8 sps:$4 sm:$0xff]  }
 0x149   :  { %v250_v30 = vsub.s32 0, %v248_v29  ;;  %v277_v55 = vadd.s32 3, %v273_v54  ;;  %v398_v56 = vand.u32 3, %v273_v54  ;;  %v4075_v54 = vld [vmem:[#allocation11 + $0x1a0] ss:$8 sps:$4 sm:$0xff]  }
 0x14b   :  { %v3510_v31 = vmin.u32 %v250_v30, %v248_v29  ;;  %v278_v57 = vand.u32 3, %v277_v55  ;;  %vm403_vm12 = vcmp.eq.s32.totalorder %v398_v56, 2  ;;  %vm400_vm14 = vcmp.eq.s32.totalorder %v398_v56, 0  ;;  %v4047_v30 = vld [vmem:[#allocation11 + $0x154] ss:$8 sps:$4 sm:$0xff]  }
 0x14c   :  { %vm399_vm0 = vcmp.lt.s32.totalorder %v398_v56, 2  ;;  %v4080_v55 = vld [vmem:[#allocation11 + $0xb4] ss:$8 sps:$4 sm:$0xff]  }
 0x14d   :  { %v252_v32 = vclz %v3510_v31  ;;  %vm283_vm13 = vcmp.eq.s32.totalorder %v278_v57, 2  ;;  %vm280_vm15 = vcmp.eq.s32.totalorder %v278_v57, 0  ;;  %vm279_vm1 = vcmp.lt.s32.totalorder %v278_v57, 2  ;;  %v4042_v31 = vld [vmem:[#allocation11 + $0x50] ss:$8 sps:$4 sm:$0xff]  }
 0x14e   :  { %v4083_v56 = vld [vmem:[#allocation11 + $0x1b4] ss:$8 sps:$4 sm:$0xff]   ;;  %v4078_v57 = vld [vmem:[#allocation11 + $0xb0] ss:$8 sps:$4 sm:$0xff]  }
 0x14f   :  { %v3511_v33 = vadd.s32 4294967294, %v252_v32  ;;  %v4045_v32 = vld [vmem:[#allocation11 + $0x150] ss:$8 sps:$4 sm:$0xff]  }
 0x151   :  { %vm3512_vm9 = vcmp.lt.s32.totalorder %v3511_v33, 0 }
 0x152   :  { %v255_v35 = vsel %vm3512_vm9, 0, %v3511_v33  ;;  %v4050_v33 = vld [vmem:[#allocation11 + $0x64] ss:$8 sps:$4 sm:$0xff]  }
 0x153   :  { %v256_v37 = vsub.s32 32, %v255_v35  ;;  %v260_v38 = vsub.s32 4294967266, %v255_v35  ;;  %v257_v40 = vshll.u32 %v248_v29, %v255_v35  ;;  %v4044_v29 = vld [vmem:[#allocation11 + $0x54] ss:$8 sps:$4 sm:$0xff]   ;;  %v4053_v35 = vld [vmem:[#allocation11 + $0x164] ss:$8 sps:$4 sm:$0xff]  }
 0x155   :  { %v258_v41 = vshrl.u32 %v240_v36, %v256_v37  ;;  %v261_v42 = vadd.s32 127, %v260_v38  ;;  %v4048_v36 = vld [vmem:[#allocation11 + $0x60] ss:$8 sps:$4 sm:$0xff]   ;;  %v4056_v38 = vld [vmem:[#allocation11 + $0x74] ss:$8 sps:$4 sm:$0xff]  }
 0x156   :  { %v4051_v37 = vld [vmem:[#allocation11 + $0x160] ss:$8 sps:$4 sm:$0xff]  }
 0x157   :  { %v259_v43 = vor.u32 %v258_v41, %v257_v40  ;;  %v262_v44 = vshll.u32 %v261_v42, 23  ;;  %v4059_v40 = vld [vmem:[#allocation11 + $0x174] ss:$8 sps:$4 sm:$0xff]   ;;  %v4054_v41 = vld [vmem:[#allocation11 + $0x70] ss:$8 sps:$4 sm:$0xff]  }
 0x158   :  { %v4057_v42 = vld [vmem:[#allocation11 + $0x170] ss:$8 sps:$4 sm:$0xff]  }
 0x159   :  { %v263_v45 = vor.u32 4788187, %v262_v44  ;;  %v266_v47 = vcvt.s32.f32 %v259_v43  ;;  %v4062_v43 = vld [vmem:[#allocation11 + $0x84] ss:$8 sps:$4 sm:$0xff]  }
 0x15a   :  { %v4065_v44 = vld [vmem:[#allocation11 + $0x184] ss:$8 sps:$4 sm:$0xff]  }
 0x15b   :  { %v264_v46 = vand.u32 2147483647, %v263_v45  ;;  %v4060_v45 = vld [vmem:[#allocation11 + $0x80] ss:$8 sps:$4 sm:$0xff]  }
 0x15d   :  { %v267_v48 = vmul.f32 %v266_v47, %v264_v46  ;;  %v4063_v46 = vld [vmem:[#allocation11 + $0x180] ss:$8 sps:$4 sm:$0xff]   ;;  %v4068_v47 = vld [vmem:[#allocation11 + $0x94] ss:$8 sps:$4 sm:$0xff]  }
 0x15f   :  { %v268_v50 = vxor.u32 2147483648, %v267_v48 }
 0x161   :  { %v269_v51 = vsel %vm186_vm10, %v268_v50, %v267_v48  ;;  %v4071_v48 = vld [vmem:[#allocation11 + $0x194] ss:$8 sps:$4 sm:$0xff]   ;;  %v4069_v50 = vld [vmem:[#allocation11 + $0x190] ss:$8 sps:$4 sm:$0xff]  }
 0x162   :  { %v272_v53 = vsel %vm185_vm11, %v5069_v34, %v269_v51  ;;  %v4021_v34 = vld [vmem:[#allocation11 + $0x110] ss:$8 sps:$4 sm:$0xff]   ;;  %v4074_v51 = vld [vmem:[#allocation11 + $0xa4] ss:$8 sps:$4 sm:$0xff]  }
 0x163   :  { %4570 = vcosq.f32 %v272_v53 }
 0x164   :  { %4572 = vsinq.f32 %v272_v53  ;;  %v4072_v53 = vld [vmem:[#allocation11 + $0xa0] ss:$8 sps:$4 sm:$0xff]  }
 0x16d   :  { %v4571_v58 = vpop.eup %4570 }
 0x16e   :  { %v4573_v59 = vpop.eup %4572  ;;  %v284_v60 = vxor.u32 2147483648, %v4571_v58 }
 0x16f   :  { %v281_v61 = vxor.u32 2147483648, %v4573_v59 }
 0x170   :  { %v405_v62 = vsel %vm403_vm12, %v284_v60, %v4573_v59  ;;  %v285_v39 = vsel %vm283_vm13, %v284_v60, %v4573_v59  ;;  %v4086_v59 = vld [vmem:[#allocation11 + $0xc4] ss:$8 sps:$4 sm:$0xff]  }
 0x171   :  { %v402_v63 = vsel %vm400_vm14, %v4571_v58, %v281_v61  ;;  %v282_v1 = vsel %vm280_vm15, %v4571_v58, %v281_v61  ;;  %v4081_v58 = vld [vmem:[#allocation11 + $0x1b0] ss:$8 sps:$4 sm:$0xff]   ;;  %v4089_v60 = vld [vmem:[#allocation11 + $0x1c4] ss:$8 sps:$4 sm:$0xff]   ;;  %v4084_v61 = vld [vmem:[#allocation11 + $0xc0] ss:$8 sps:$4 sm:$0xff]  }
 0x172   :  { %v406_v2 = vsel %vm399_vm0, %v402_v63, %v405_v62  ;;  %v286_v3 = vsel %vm279_vm1, %v282_v1, %v285_v39  ;;  %v4087_v62 = vld [vmem:[#allocation11 + $0x1c0] ss:$8 sps:$4 sm:$0xff]   ;;  %v4092_v39 = vld [vmem:[#allocation11 + $0xd4] ss:$8 sps:$4 sm:$0xff]   ;;  %v4090_v1 = vld [vmem:[#allocation11 + $0xd0] ss:$8 sps:$4 sm:$0xff]  }
 0x173   :  { %v407_v6 = vsel %vm276_vm2, nan, %v406_v2  ;;  %v287_v7 = vsel %vm276_vm2, nan, %v286_v3  ;;  %v4095_v63 = vld [vmem:[#allocation11 + $0x1d4] ss:$8 sps:$4 sm:$0xff]   ;;  %v4093_v2 = vld [vmem:[#allocation11 + $0x1d0] ss:$8 sps:$4 sm:$0xff]  }
 0x174   :  { %v408_v10 = vpack.c.bf16 %v407_v6, %v407_v6  ;;  %v288_v11 = vpack.c.bf16 %v287_v7, %v287_v7  ;;  %v4098_v3 = vld [vmem:[#allocation11 + $0xe4] ss:$8 sps:$4 sm:$0xff]   ;;  %v4099_v6 = vld [vmem:[#allocation11 + $0x1e0] ss:$8 sps:$4 sm:$0xff]   ;;  %v4104_v7 = vld [vmem:[#allocation11 + $0xf4] ss:$8 sps:$4 sm:$0xff]  }
 0x176   :  { %3943 = vmatmul.mubr.bf16.vlgmr.msra.gmra.mrb[0].mxu0 %v408_v10  ;;  %3963 = vmatmul.mubr.bf16.vlgmr.msra.gmra.mrb[0].mxu1 %v288_v11  ;;  %v4105_v10 = vld [vmem:[#allocation11 + $0x1f0] ss:$8 sps:$4 sm:$0xff]   ;;  %v688_v11 = vld [vmem:[#allocation5] sm:$0xff] }
 0x177   :  { %1081 = vmatpush1.bf16.msra.mxu0 %v4012_v8  ;;  %1122 = vmatpush1.bf16.msra.mxu1 %v4015_v9  ;;  %v4107_v8 = vld [vmem:[#allocation11 + $0x1f4] ss:$8 sps:$4 sm:$0xff]   ;;  %v4102_v9 = vld [vmem:[#allocation11 + $0xf0] ss:$8 sps:$4 sm:$0xff]  }
 0x178   :  { %1082 = vmatprep.subr.bf16.mxu0 %v4020_v12  ;;  %1123 = vmatprep.subr.bf16.mxu1 %v4023_v13  ;;  %v690_v12 = vld [vmem:[#allocation5 + $0x10] sm:$0xff]  ;;  %v4110_v13 = vld [vmem:[#allocation10 + $0x4] ss:$8 sps:$4 sm:$0xff]  }
 0x179   :  { %1112 = vmatprep.mubr.bf16.mxu0 %v693_v14  ;;  %1153 = vmatprep.mubr.bf16.mxu1 %v695_v15  ;;  %v4113_v14 = vld [vmem:[#allocation10 + $0x104] ss:$8 sps:$4 sm:$0xff]   ;;  %v692_v15 = vpack.c.bf16 %v688_v11, %v688_v11  ;;  %v4189_v11 = vld [vmem:[#allocation10 + $0x1d0] ss:$8 sps:$4 sm:$0xff]  }
 0x17b   :  { %1083 = vmatpush1.bf16.msra.mxu0 %v4018_v16  ;;  %1124 = vmatpush1.bf16.msra.mxu1 %v4021_v34  ;;  %v694_v16 = vpack.c.bf16 %v690_v12, %v690_v12  ;;  %v617_v34 = vld [vmem:[#allocation2 + $0x8] sm:$0xff] }
 0x17c   :  { %1084 = vmatprep.subr.bf16.mxu0 %v4026_v17  ;;  %1125 = vmatprep.subr.bf16.mxu1 %v4029_v18  ;;  %v619_v17 = vld [vmem:[#allocation2 + $0x18] sm:$0xff]  ;;  %v4108_v18 = vld [vmem:[#allocation10] ss:$8 sps:$4 sm:$0xff]   ;;  %v4194_v12 = vld [vmem:[#allocation10 + $0xe4] ss:$8 sps:$4 sm:$0xff]  }
 0x17f   :  { %1085 = vmatpush1.bf16.msra.mxu0 %v4024_v19  ;;  %1126 = vmatpush1.bf16.msra.mxu1 %v4027_v20  ;;  %v4111_v19 = vld [vmem:[#allocation10 + $0x100] ss:$8 sps:$4 sm:$0xff]   ;;  %v4116_v20 = vld [vmem:[#allocation10 + $0x14] ss:$8 sps:$4 sm:$0xff]  }
 0x180   :  { %1086 = vmatprep.subr.bf16.mxu0 %v4032_v21  ;;  %1127 = vmatprep.subr.bf16.mxu1 %v4035_v22  ;;  %v4119_v21 = vld [vmem:[#allocation10 + $0x114] ss:$8 sps:$4 sm:$0xff]   ;;  %v621_v22 = vpack.c.bf16 %v617_v34, %v617_v34 }
 0x181   :  { %v4203_v34 = vld [vmem:[#allocation10 + $0x1f4] ss:$8 sps:$4 sm:$0xff]  }
 0x183   :  { %1087 = vmatpush1.bf16.msra.mxu0 %v4030_v23  ;;  %1128 = vmatpush1.bf16.msra.mxu1 %v4033_v24  ;;  %v623_v23 = vpack.c.bf16 %v619_v17, %v619_v17  ;;  %v4114_v24 = vld [vmem:[#allocation10 + $0x10] ss:$8 sps:$4 sm:$0xff]  }
 0x184   :  { %1088 = vmatprep.subr.bf16.mxu0 %v4038_v25  ;;  %1129 = vmatprep.subr.bf16.mxu1 %v4041_v26  ;;  %v4117_v25 = vld [vmem:[#allocation10 + $0x110] ss:$8 sps:$4 sm:$0xff]   ;;  %v4122_v26 = vld [vmem:[#allocation10 + $0x24] ss:$8 sps:$4 sm:$0xff]  }
 0x185   :  { %v4198_v17 = vld [vmem:[#allocation10 + $0xf0] ss:$8 sps:$4 sm:$0xff]  }
 0x187   :  { %1089 = vmatpush1.bf16.msra.mxu0 %v4036_v27  ;;  %1130 = vmatpush1.bf16.msra.mxu1 %v4039_v28  ;;  %v4125_v27 = vld [vmem:[#allocation10 + $0x124] ss:$8 sps:$4 sm:$0xff]   ;;  %v4120_v28 = vld [vmem:[#allocation10 + $0x20] ss:$8 sps:$4 sm:$0xff]  }
 0x188   :  { %1090 = vmatprep.subr.bf16.mxu0 %v4044_v29  ;;  %1131 = vmatprep.subr.bf16.mxu1 %v4047_v30  ;;  %v4123_v29 = vld [vmem:[#allocation10 + $0x120] ss:$8 sps:$4 sm:$0xff]   ;;  %v4128_v30 = vld [vmem:[#allocation10 + $0x34] ss:$8 sps:$4 sm:$0xff]  }
 0x18b   :  { %1091 = vmatpush1.bf16.msra.mxu0 %v4042_v31  ;;  %1132 = vmatpush1.bf16.msra.mxu1 %v4045_v32  ;;  %v4131_v31 = vld [vmem:[#allocation10 + $0x134] ss:$8 sps:$4 sm:$0xff]   ;;  %v4126_v32 = vld [vmem:[#allocation10 + $0x30] ss:$8 sps:$4 sm:$0xff]  }
 0x18c   :  { %1092 = vmatprep.subr.bf16.mxu0 %v4050_v33  ;;  %1133 = vmatprep.subr.bf16.mxu1 %v4053_v35  ;;  %v4129_v33 = vld [vmem:[#allocation10 + $0x130] ss:$8 sps:$4 sm:$0xff]   ;;  %v4134_v35 = vld [vmem:[#allocation10 + $0x44] ss:$8 sps:$4 sm:$0xff]  }
 0x18f   :  { %1093 = vmatpush1.bf16.msra.mxu0 %v4048_v36  ;;  %1134 = vmatpush1.bf16.msra.mxu1 %v4051_v37  ;;  %v4137_v36 = vld [vmem:[#allocation10 + $0x144] ss:$8 sps:$4 sm:$0xff]   ;;  %v4132_v37 = vld [vmem:[#allocation10 + $0x40] ss:$8 sps:$4 sm:$0xff]  }
 0x190   :  { %1094 = vmatprep.subr.bf16.mxu0 %v4056_v38  ;;  %1135 = vmatprep.subr.bf16.mxu1 %v4059_v40  ;;  %v4135_v38 = vld [vmem:[#allocation10 + $0x140] ss:$8 sps:$4 sm:$0xff]   ;;  %v4140_v40 = vld [vmem:[#allocation10 + $0x54] ss:$8 sps:$4 sm:$0xff]  }
 0x193   :  { %1095 = vmatpush1.bf16.msra.mxu0 %v4054_v41  ;;  %1136 = vmatpush1.bf16.msra.mxu1 %v4057_v42  ;;  %v4143_v41 = vld [vmem:[#allocation10 + $0x154] ss:$8 sps:$4 sm:$0xff]   ;;  %v4138_v42 = vld [vmem:[#allocation10 + $0x50] ss:$8 sps:$4 sm:$0xff]  }
 0x194   :  { %1096 = vmatprep.subr.bf16.mxu0 %v4062_v43  ;;  %1137 = vmatprep.subr.bf16.mxu1 %v4065_v44  ;;  %v4141_v43 = vld [vmem:[#allocation10 + $0x150] ss:$8 sps:$4 sm:$0xff]   ;;  %v4146_v44 = vld [vmem:[#allocation10 + $0x64] ss:$8 sps:$4 sm:$0xff]  }
 0x197   :  { %1097 = vmatpush1.bf16.msra.mxu0 %v4060_v45  ;;  %1138 = vmatpush1.bf16.msra.mxu1 %v4063_v46  ;;  %v4149_v45 = vld [vmem:[#allocation10 + $0x164] ss:$8 sps:$4 sm:$0xff]   ;;  %v4144_v46 = vld [vmem:[#allocation10 + $0x60] ss:$8 sps:$4 sm:$0xff]  }
 0x198   :  { %1098 = vmatprep.subr.bf16.mxu0 %v4068_v47  ;;  %1139 = vmatprep.subr.bf16.mxu1 %v4071_v48  ;;  %v4147_v47 = vld [vmem:[#allocation10 + $0x160] ss:$8 sps:$4 sm:$0xff]   ;;  %v4152_v48 = vld [vmem:[#allocation10 + $0x74] ss:$8 sps:$4 sm:$0xff]  }
 0x19b   :  { %1099 = vmatpush1.bf16.msra.mxu0 %v4066_v49  ;;  %1140 = vmatpush1.bf16.msra.mxu1 %v4069_v50  ;;  %v4155_v49 = vld [vmem:[#allocation10 + $0x174] ss:$8 sps:$4 sm:$0xff]   ;;  %v4150_v50 = vld [vmem:[#allocation10 + $0x70] ss:$8 sps:$4 sm:$0xff]  }
 0x19c   :  { %1100 = vmatprep.subr.bf16.mxu0 %v4074_v51  ;;  %1141 = vmatprep.subr.bf16.mxu1 %v4077_v52  ;;  %v4153_v51 = vld [vmem:[#allocation10 + $0x170] ss:$8 sps:$4 sm:$0xff]   ;;  %v4158_v52 = vld [vmem:[#allocation10 + $0x84] ss:$8 sps:$4 sm:$0xff]  }
 0x19f   :  { %1101 = vmatpush1.bf16.msra.mxu0 %v4072_v53  ;;  %1142 = vmatpush1.bf16.msra.mxu1 %v4075_v54  ;;  %v4161_v53 = vld [vmem:[#allocation10 + $0x184] ss:$8 sps:$4 sm:$0xff]   ;;  %v4156_v54 = vld [vmem:[#allocation10 + $0x80] ss:$8 sps:$4 sm:$0xff]  }
 0x1a0   :  { %1102 = vmatprep.subr.bf16.mxu0 %v4080_v55  ;;  %1143 = vmatprep.subr.bf16.mxu1 %v4083_v56  ;;  %v4159_v55 = vld [vmem:[#allocation10 + $0x180] ss:$8 sps:$4 sm:$0xff]   ;;  %v4164_v56 = vld [vmem:[#allocation10 + $0x94] ss:$8 sps:$4 sm:$0xff]  }
 0x1a3   :  { %1103 = vmatpush1.bf16.msra.mxu0 %v4078_v57  ;;  %1144 = vmatpush1.bf16.msra.mxu1 %v4081_v58  ;;  %v4167_v57 = vld [vmem:[#allocation10 + $0x194] ss:$8 sps:$4 sm:$0xff]   ;;  %v4162_v58 = vld [vmem:[#allocation10 + $0x90] ss:$8 sps:$4 sm:$0xff]  }
 0x1a4   :  { %1104 = vmatprep.subr.bf16.mxu0 %v4086_v59  ;;  %1145 = vmatprep.subr.bf16.mxu1 %v4089_v60  ;;  %v4165_v59 = vld [vmem:[#allocation10 + $0x190] ss:$8 sps:$4 sm:$0xff]   ;;  %v4170_v60 = vld [vmem:[#allocation10 + $0xa4] ss:$8 sps:$4 sm:$0xff]  }
 0x1a7   :  { %1105 = vmatpush1.bf16.msra.mxu0 %v4084_v61  ;;  %1146 = vmatpush1.bf16.msra.mxu1 %v4087_v62  ;;  %v4173_v61 = vld [vmem:[#allocation10 + $0x1a4] ss:$8 sps:$4 sm:$0xff]   ;;  %v4168_v62 = vld [vmem:[#allocation10 + $0xa0] ss:$8 sps:$4 sm:$0xff]  }
 0x1a8   :  { %1106 = vmatprep.subr.bf16.mxu0 %v4092_v39  ;;  %1147 = vmatprep.subr.bf16.mxu1 %v4095_v63  ;;  %v4171_v39 = vld [vmem:[#allocation10 + $0x1a0] ss:$8 sps:$4 sm:$0xff]   ;;  %v4176_v63 = vld [vmem:[#allocation10 + $0xb4] ss:$8 sps:$4 sm:$0xff]  }
 0x1ab   :  { %1107 = vmatpush1.bf16.msra.mxu0 %v4090_v1  ;;  %1148 = vmatpush1.bf16.msra.mxu1 %v4093_v2  ;;  %v4179_v1 = vld [vmem:[#allocation10 + $0x1b4] ss:$8 sps:$4 sm:$0xff]   ;;  %v4174_v2 = vld [vmem:[#allocation10 + $0xb0] ss:$8 sps:$4 sm:$0xff]  }
 0x1ac   :  { %1108 = vmatprep.subr.bf16.mxu0 %v4098_v3  ;;  %1149 = vmatprep.subr.bf16.mxu1 %v4101_v4  ;;  %v4177_v3 = vld [vmem:[#allocation10 + $0x1b0] ss:$8 sps:$4 sm:$0xff]   ;;  %v4182_v4 = vld [vmem:[#allocation10 + $0xc4] ss:$8 sps:$4 sm:$0xff]  }
 0x1af   :  { %1109 = vmatpush1.bf16.msra.mxu0 %v4096_v5  ;;  %1150 = vmatpush1.bf16.msra.mxu1 %v4099_v6  ;;  %v4185_v5 = vld [vmem:[#allocation10 + $0x1c4] ss:$8 sps:$4 sm:$0xff]   ;;  %v4180_v6 = vld [vmem:[#allocation10 + $0xc0] ss:$8 sps:$4 sm:$0xff]  }
 0x1b0   :  { %1110 = vmatprep.subr.bf16.mxu0 %v4104_v7  ;;  %1151 = vmatprep.subr.bf16.mxu1 %v4107_v8  ;;  %v4183_v7 = vld [vmem:[#allocation10 + $0x1c0] ss:$8 sps:$4 sm:$0xff]   ;;  %v4188_v8 = vld [vmem:[#allocation10 + $0xd4] ss:$8 sps:$4 sm:$0xff]  }
 0x1b3   :  { %1111 = vmatpush1.bf16.msra.mxu0 %v4102_v9  ;;  %1152 = vmatpush1.bf16.msra.mxu1 %v4105_v10  ;;  %v4191_v9 = vld [vmem:[#allocation10 + $0x1d4] ss:$8 sps:$4 sm:$0xff]   ;;  %v4186_v10 = vld [vmem:[#allocation10 + $0xd0] ss:$8 sps:$4 sm:$0xff]  }
 0x1b4   :  { %1482 = vmatprep.subr.bf16.mxu0 %v4110_v13  ;;  %1523 = vmatprep.subr.bf16.mxu1 %v4113_v14  ;;  %v4197_v13 = vld [vmem:[#allocation10 + $0x1e4] ss:$8 sps:$4 sm:$0xff]   ;;  %v4192_v14 = vld [vmem:[#allocation10 + $0xe0] ss:$8 sps:$4 sm:$0xff]  }
 0x1b6   :  { %1113 = vmatmul.mubr.bf16.vlgmr.msra.gmra.mrb[4].mxu0 %v692_v15  ;;  %1154 = vmatmul.mubr.bf16.vlgmr.msra.gmra.mrb[4].mxu1 %v694_v16  ;;  %v4195_v15 = vld [vmem:[#allocation10 + $0x1e0] ss:$8 sps:$4 sm:$0xff]   ;;  %v4200_v16 = vld [vmem:[#allocation10 + $0xf4] ss:$8 sps:$4 sm:$0xff]  }
 0x1b7   :  { %1483 = vmatpush1.bf16.msra.mxu0 %v4108_v18  ;;  %1524 = vmatpush1.bf16.msra.mxu1 %v4111_v19  ;;  %v4201_v18 = vld [vmem:[#allocation10 + $0x1f0] ss:$8 sps:$4 sm:$0xff]   ;;  %v616_v19 = vld [vmem:[#allocation2] sm:$0xff] }
 0x1b8   :  { %1484 = vmatprep.subr.bf16.mxu0 %v4116_v20  ;;  %1525 = vmatprep.subr.bf16.mxu1 %v4119_v21  ;;  %v618_v20 = vld [vmem:[#allocation2 + $0x10] sm:$0xff]  ;;  %v4206_v21 = vld [vmem:[#allocation13 + $0x4] ss:$8 sps:$4 sm:$0xff]  }
 0x1b9   :  { %1514 = vmatprep.mubr.bf16.mxu0 %v621_v22  ;;  %1555 = vmatprep.mubr.bf16.mxu1 %v623_v23  ;;  %v620_v22 = vpack.c.bf16 %v616_v19, %v616_v19  ;;  %v622_v23 = vpack.c.bf16 %v618_v20, %v618_v20  ;;  %v4267_v19 = vld [vmem:[#allocation14 + $0xd0] ss:$8 sps:$4 sm:$0xff]  }
 0x1bb   :  { %1485 = vmatpush1.bf16.msra.mxu0 %v4114_v24  ;;  %1526 = vmatpush1.bf16.msra.mxu1 %v4117_v25  ;;  %v4204_v24 = vld [vmem:[#allocation13] ss:$8 sps:$4 sm:$0xff]   ;;  %v4209_v25 = vld [vmem:[#allocation13 + $0x14] ss:$8 sps:$4 sm:$0xff]  }
 0x1bc   :  { %1486 = vmatprep.subr.bf16.mxu0 %v4122_v26  ;;  %1527 = vmatprep.subr.bf16.mxu1 %v4125_v27  ;;  %v4207_v26 = vld [vmem:[#allocation13 + $0x10] ss:$8 sps:$4 sm:$0xff]   ;;  %v4212_v27 = vld [vmem:[#allocation13 + $0x24] ss:$8 sps:$4 sm:$0xff]  }
 0x1bf   :  { %1487 = vmatpush1.bf16.msra.mxu0 %v4120_v28  ;;  %1528 = vmatpush1.bf16.msra.mxu1 %v4123_v29  ;;  %v4210_v28 = vld [vmem:[#allocation13 + $0x20] ss:$8 sps:$4 sm:$0xff]   ;;  %v4215_v29 = vld [vmem:[#allocation13 + $0x34] ss:$8 sps:$4 sm:$0xff]  }
 0x1c0   :  { %1488 = vmatprep.subr.bf16.mxu0 %v4128_v30  ;;  %1529 = vmatprep.subr.bf16.mxu1 %v4131_v31  ;;  %v4213_v30 = vld [vmem:[#allocation13 + $0x30] ss:$8 sps:$4 sm:$0xff]   ;;  %v4218_v31 = vld [vmem:[#allocation13 + $0x44] ss:$8 sps:$4 sm:$0xff]  }
 0x1c3   :  { %1489 = vmatpush1.bf16.msra.mxu0 %v4126_v32  ;;  %1530 = vmatpush1.bf16.msra.mxu1 %v4129_v33  ;;  %v4216_v32 = vld [vmem:[#allocation13 + $0x40] ss:$8 sps:$4 sm:$0xff]   ;;  %v4221_v33 = vld [vmem:[#allocation13 + $0x54] ss:$8 sps:$4 sm:$0xff]  }
 0x1c4   :  { %1490 = vmatprep.subr.bf16.mxu0 %v4134_v35  ;;  %1531 = vmatprep.subr.bf16.mxu1 %v4137_v36  ;;  %v4219_v35 = vld [vmem:[#allocation13 + $0x50] ss:$8 sps:$4 sm:$0xff]   ;;  %v4224_v36 = vld [vmem:[#allocation13 + $0x64] ss:$8 sps:$4 sm:$0xff]  }
 0x1c7   :  { %1491 = vmatpush1.bf16.msra.mxu0 %v4132_v37  ;;  %1532 = vmatpush1.bf16.msra.mxu1 %v4135_v38  ;;  %v4227_v37 = vld [vmem:[#allocation13 + $0x74] ss:$8 sps:$4 sm:$0xff]   ;;  %v4225_v38 = vld [vmem:[#allocation13 + $0x70] ss:$8 sps:$4 sm:$0xff]  }
 0x1c8   :  { %1492 = vmatprep.subr.bf16.mxu0 %v4140_v40  ;;  %1533 = vmatprep.subr.bf16.mxu1 %v4143_v41 }
 0x1cb   :  { %1493 = vmatpush1.bf16.msra.mxu0 %v4138_v42  ;;  %1534 = vmatpush1.bf16.msra.mxu1 %v4141_v43  ;;  %v3533_v42 = vld [vmem:[%s5163_s6] ss:$0 sm:$0xff] }
 0x1cc   :  { %1494 = vmatprep.subr.bf16.mxu0 %v4146_v44  ;;  %1535 = vmatprep.subr.bf16.mxu1 %v4149_v45 }
 0x1cf   :  { %1495 = vmatpush1.bf16.msra.mxu0 %v4144_v46  ;;  %1536 = vmatpush1.bf16.msra.mxu1 %v4147_v47 }
 0x1d0   :  { %1496 = vmatprep.subr.bf16.mxu0 %v4152_v48  ;;  %1537 = vmatprep.subr.bf16.mxu1 %v4155_v49 }
 0x1d3   :  { %1497 = vmatpush1.bf16.msra.mxu0 %v4150_v50  ;;  %1538 = vmatpush1.bf16.msra.mxu1 %v4153_v51  ;;  %v4228_v51 = vld [vmem:[#allocation14] ss:$8 sps:$4 sm:$0xff]  }
 0x1d4   :  { %1498 = vmatprep.subr.bf16.mxu0 %v4158_v52  ;;  %1539 = vmatprep.subr.bf16.mxu1 %v4161_v53  ;;  %v4230_v52 = vld [vmem:[#allocation14 + $0x4] ss:$8 sps:$4 sm:$0xff]  }
 0x1d7   :  { %1499 = vmatpush1.bf16.msra.mxu0 %v4156_v54  ;;  %1540 = vmatpush1.bf16.msra.mxu1 %v4159_v55  ;;  %v4233_v54 = vld [vmem:[#allocation14 + $0x14] ss:$8 sps:$4 sm:$0xff]   ;;  %v4231_v55 = vld [vmem:[#allocation14 + $0x10] ss:$8 sps:$4 sm:$0xff]  }
 0x1d8   :  { %1500 = vmatprep.subr.bf16.mxu0 %v4164_v56  ;;  %1541 = vmatprep.subr.bf16.mxu1 %v4167_v57  ;;  %v4236_v56 = vld [vmem:[#allocation14 + $0x24] ss:$8 sps:$4 sm:$0xff]   ;;  %v4234_v57 = vld [vmem:[#allocation14 + $0x20] ss:$8 sps:$4 sm:$0xff]  }
 0x1db   :  { %1501 = vmatpush1.bf16.msra.mxu0 %v4162_v58  ;;  %1542 = vmatpush1.bf16.msra.mxu1 %v4165_v59  ;;  %v4239_v58 = vld [vmem:[#allocation14 + $0x34] ss:$8 sps:$4 sm:$0xff]   ;;  %v4237_v59 = vld [vmem:[#allocation14 + $0x30] ss:$8 sps:$4 sm:$0xff]  }
 0x1dc   :  { %1502 = vmatprep.subr.bf16.mxu0 %v4170_v60  ;;  %1543 = vmatprep.subr.bf16.mxu1 %v4173_v61  ;;  %v4242_v60 = vld [vmem:[#allocation14 + $0x44] ss:$8 sps:$4 sm:$0xff]  }
 0x1df   :  { %1503 = vmatpush1.bf16.msra.mxu0 %v4168_v62  ;;  %1544 = vmatpush1.bf16.msra.mxu1 %v4171_v39  ;;  %v4240_v39 = vld [vmem:[#allocation14 + $0x40] ss:$8 sps:$4 sm:$0xff]  }
 0x1e0   :  { %1504 = vmatprep.subr.bf16.mxu0 %v4176_v63  ;;  %1545 = vmatprep.subr.bf16.mxu1 %v4179_v1  ;;  %v4245_v63 = vld [vmem:[#allocation14 + $0x54] ss:$8 sps:$4 sm:$0xff]   ;;  %v4243_v1 = vld [vmem:[#allocation14 + $0x50] ss:$8 sps:$4 sm:$0xff]  }
 0x1e3   :  { %1505 = vmatpush1.bf16.msra.mxu0 %v4174_v2  ;;  %1546 = vmatpush1.bf16.msra.mxu1 %v4177_v3  ;;  %v4248_v2 = vld [vmem:[#allocation14 + $0x64] ss:$8 sps:$4 sm:$0xff]   ;;  %v4246_v3 = vld [vmem:[#allocation14 + $0x60] ss:$8 sps:$4 sm:$0xff]  }
 0x1e4   :  { %1506 = vmatprep.subr.bf16.mxu0 %v4182_v4  ;;  %1547 = vmatprep.subr.bf16.mxu1 %v4185_v5  ;;  %v4251_v4 = vld [vmem:[#allocation14 + $0x74] ss:$8 sps:$4 sm:$0xff]  }
 0x1e7   :  { %1507 = vmatpush1.bf16.msra.mxu0 %v4180_v6  ;;  %1548 = vmatpush1.bf16.msra.mxu1 %v4183_v7  ;;  %v4249_v7 = vld [vmem:[#allocation14 + $0x70] ss:$8 sps:$4 sm:$0xff]  }
 0x1e8   :  { %1508 = vmatprep.subr.bf16.mxu0 %v4188_v8  ;;  %1549 = vmatprep.subr.bf16.mxu1 %v4191_v9  ;;  %v4254_v8 = vld [vmem:[#allocation14 + $0x84] ss:$8 sps:$4 sm:$0xff]  }
 0x1eb   :  { %1509 = vmatpush1.bf16.msra.mxu0 %v4186_v10  ;;  %1550 = vmatpush1.bf16.msra.mxu1 %v4189_v11  ;;  %v4252_v10 = vld [vmem:[#allocation14 + $0x80] ss:$8 sps:$4 sm:$0xff]   ;;  %v4257_v11 = vld [vmem:[#allocation14 + $0x94] ss:$8 sps:$4 sm:$0xff]  }
 0x1ec   :  { %1510 = vmatprep.subr.bf16.mxu0 %v4194_v12  ;;  %1551 = vmatprep.subr.bf16.mxu1 %v4197_v13  ;;  %v4255_v12 = vld [vmem:[#allocation14 + $0x90] ss:$8 sps:$4 sm:$0xff]   ;;  %v4260_v13 = vld [vmem:[#allocation14 + $0xa4] ss:$8 sps:$4 sm:$0xff]  }
 0x1ef   :  { %1511 = vmatpush1.bf16.msra.mxu0 %v4192_v14  ;;  %1552 = vmatpush1.bf16.msra.mxu1 %v4195_v15  ;;  %v4258_v14 = vld [vmem:[#allocation14 + $0xa0] ss:$8 sps:$4 sm:$0xff]   ;;  %v4263_v15 = vld [vmem:[#allocation14 + $0xb4] ss:$8 sps:$4 sm:$0xff]  }
 0x1f0   :  { %1512 = vmatprep.subr.bf16.mxu0 %v4200_v16  ;;  %1553 = vmatprep.subr.bf16.mxu1 %v4203_v34  ;;  %v4261_v16 = vld [vmem:[#allocation14 + $0xb0] ss:$8 sps:$4 sm:$0xff]   ;;  %v4266_v34 = vld [vmem:[#allocation14 + $0xc4] ss:$8 sps:$4 sm:$0xff]  }
 0x1f3   :  { %1513 = vmatpush1.bf16.msra.mxu0 %v4198_v17  ;;  %1554 = vmatpush1.bf16.msra.mxu1 %v4201_v18  ;;  %v4264_v17 = vld [vmem:[#allocation14 + $0xc0] ss:$8 sps:$4 sm:$0xff]   ;;  %v4269_v18 = vld [vmem:[#allocation14 + $0xd4] ss:$8 sps:$4 sm:$0xff]  }
 0x1f4   :  { %1661 = vmatprep.subr.bf16.mxu0 %v4206_v21  ;;  %1926 = vmatprep.subr.bf16.mxu1 %v4230_v52  ;;  %v4282_v52 = vld [vmem:[#allocation14 + $0x120] ss:$8 sps:$4 sm:$0xff]  }
 0x1f6   :  { %1515 = vmatmul.mubr.bf16.vlgmr.msra.gmra.mrb[8].mxu0 %v620_v22  ;;  %1556 = vmatmul.mubr.bf16.vlgmr.msra.gmra.mrb[8].mxu1 %v622_v23 }
 0x1f7   :  { %1662 = vmatpush1.bf16.msra.mxu0 %v4204_v24  ;;  %1693 = vmatprep.mubr.bf16.mxu0 %v4825_v0  ;;  %v4222_v0 = vld [vmem:[#allocation13 + $0x60] ss:$8 sps:$4 sm:$0xff]  }
 0x1f8   :  { %1663 = vmatprep.subr.bf16.mxu0 %v4209_v25  ;;  %1927 = vmatpush1.bf16.msra.mxu1 %v4228_v51  ;;  %v4284_v51 = vld [vmem:[#allocation14 + $0x124] ss:$8 sps:$4 sm:$0xff]  }
 0x1f9   :  { %1928 = vmatprep.subr.bf16.mxu1 %v4233_v54  ;;  %v4285_v54 = vld [vmem:[#allocation14 + $0x130] ss:$8 sps:$4 sm:$0xff]  }
 0x1fb   :  { %1664 = vmatpush1.bf16.msra.mxu0 %v4207_v26 }
 0x1fc   :  { %1665 = vmatprep.subr.bf16.mxu0 %v4212_v27  ;;  %1929 = vmatpush1.bf16.msra.mxu1 %v4231_v55  ;;  %v4290_v55 = vld [vmem:[#allocation14 + $0x144] ss:$8 sps:$4 sm:$0xff]  }
 0x1fd   :  { %1930 = vmatprep.subr.bf16.mxu1 %v4236_v56  ;;  %v4288_v56 = vld [vmem:[#allocation14 + $0x140] ss:$8 sps:$4 sm:$0xff]  }
 0x1ff   :  { %1666 = vmatpush1.bf16.msra.mxu0 %v4210_v28 }
 0x200   :  { %1667 = vmatprep.subr.bf16.mxu0 %v4215_v29  ;;  %1931 = vmatpush1.bf16.msra.mxu1 %v4234_v57  ;;  %v4293_v57 = vld [vmem:[#allocation14 + $0x154] ss:$8 sps:$4 sm:$0xff]  }
 0x201   :  { %1932 = vmatprep.subr.bf16.mxu1 %v4239_v58  ;;  %v4291_v58 = vld [vmem:[#allocation14 + $0x150] ss:$8 sps:$4 sm:$0xff]  }
 0x203   :  { %1668 = vmatpush1.bf16.msra.mxu0 %v4213_v30  ;;  %v4272_v30 = vld [vmem:[#allocation14 + $0xe4] ss:$8 sps:$4 sm:$0xff]  }
 0x204   :  { %1669 = vmatprep.subr.bf16.mxu0 %v4218_v31  ;;  %1933 = vmatpush1.bf16.msra.mxu1 %v4237_v59  ;;  %v4270_v31 = vld [vmem:[#allocation14 + $0xe0] ss:$8 sps:$4 sm:$0xff]   ;;  %v4296_v59 = vld [vmem:[#allocation14 + $0x164] ss:$8 sps:$4 sm:$0xff]  }
 0x205   :  { %1934 = vmatprep.subr.bf16.mxu1 %v4242_v60  ;;  %v4294_v60 = vld [vmem:[#allocation14 + $0x160] ss:$8 sps:$4 sm:$0xff]  }
 0x207   :  { %1670 = vmatpush1.bf16.msra.mxu0 %v4216_v32  ;;  %v4275_v32 = vld [vmem:[#allocation14 + $0xf4] ss:$8 sps:$4 sm:$0xff]  }
 0x208   :  { %1671 = vmatprep.subr.bf16.mxu0 %v4221_v33  ;;  %1935 = vmatpush1.bf16.msra.mxu1 %v4240_v39  ;;  %v4273_v33 = vld [vmem:[#allocation14 + $0xf0] ss:$8 sps:$4 sm:$0xff]   ;;  %v4302_v39 = vld [vmem:[#allocation14 + $0x184] ss:$8 sps:$4 sm:$0xff]  }
 0x209   :  { %1936 = vmatprep.subr.bf16.mxu1 %v4245_v63  ;;  %v4300_v63 = vld [vmem:[#allocation14 + $0x180] ss:$8 sps:$4 sm:$0xff]  }
 0x20b   :  { %1672 = vmatpush1.bf16.msra.mxu0 %v4219_v35 }
 0x20c   :  { %1673 = vmatprep.subr.bf16.mxu0 %v4224_v36  ;;  %1937 = vmatpush1.bf16.msra.mxu1 %v4243_v1  ;;  %v4305_v1 = vld [vmem:[#allocation14 + $0x194] ss:$8 sps:$4 sm:$0xff]  }
 0x20d   :  { %1938 = vmatprep.subr.bf16.mxu1 %v4248_v2  ;;  %v4303_v2 = vld [vmem:[#allocation14 + $0x190] ss:$8 sps:$4 sm:$0xff]  }
 0x20f   :  { %1674 = vmatpush1.bf16.msra.mxu0 %v4222_v0 }
 0x210   :  { %1675 = vmatprep.subr.bf16.mxu0 %v4227_v37  ;;  %1939 = vmatpush1.bf16.msra.mxu1 %v4246_v3  ;;  %v4308_v3 = vld [vmem:[#allocation14 + $0x1a4] ss:$8 sps:$4 sm:$0xff]  }
 0x211   :  { %1940 = vmatprep.subr.bf16.mxu1 %v4251_v4  ;;  %v4306_v4 = vld [vmem:[#allocation14 + $0x1a0] ss:$8 sps:$4 sm:$0xff]  }
 0x213   :  { %1676 = vmatpush1.bf16.msra.mxu0 %v4225_v38 }
 0x214   :  { %1941 = vmatpush1.bf16.msra.mxu1 %v4249_v7  ;;  %v4314_v7 = vld [vmem:[#allocation14 + $0x1c4] ss:$8 sps:$4 sm:$0xff]  }
 0x215   :  { %1942 = vmatprep.subr.bf16.mxu1 %v4254_v8  ;;  %v4312_v8 = vld [vmem:[#allocation14 + $0x1c0] ss:$8 sps:$4 sm:$0xff]  }
 0x218   :  { %1943 = vmatpush1.bf16.msra.mxu1 %v4252_v10  ;;  %v4315_v10 = vld [vmem:[#allocation14 + $0x1d0] ss:$8 sps:$4 sm:$0xff]  }
 0x219   :  { %1944 = vmatprep.subr.bf16.mxu1 %v4257_v11  ;;  %v1706_v11 = vlaneseq }
 0x21c   :  { %1945 = vmatpush1.bf16.msra.mxu1 %v4255_v12  ;;  %v5098_v12 = vshrl.u32 %v1706_v11, 7  ;;  %v4368_v11 = vld [vmem:[#allocation14 + $0x2e4] ss:$8 sps:$4 sm:$0xff]  }
 0x21d   :  { %1946 = vmatprep.subr.bf16.mxu1 %v4260_v13 }
 0x21e   :  { %v5101_v13 = vsub.s32 0, %v5098_v12 }
 0x220   :  { %1947 = vmatpush1.bf16.msra.mxu1 %v4258_v14  ;;  %v1704_v14 = vld [vmem:[%s5167_s10] sm:$0x3] }
 0x221   :  { %1948 = vmatprep.subr.bf16.mxu1 %v4263_v15  ;;  %v5107_v15 = vsub.s32 1, %v5098_v12 }
 0x224   :  { %1949 = vmatpush1.bf16.msra.mxu1 %v4261_v16  ;;  %v1709_v16 = vrot.slane %v1704_v14, %v5101_v13 }
 0x225   :  { %1950 = vmatprep.subr.bf16.mxu1 %v4266_v34 }
 0x228   :  { %1951 = vmatpush1.bf16.msra.mxu1 %v4264_v17  ;;  %v1713_v17 = vrot.slane %v1704_v14, %v5107_v15  ;;  %v4366_v14 = vld [vmem:[#allocation14 + $0x2e0] ss:$8 sps:$4 sm:$0xff]  }
 0x229   :  { %1952 = vmatprep.subr.bf16.mxu1 %v4269_v18 }
 0x22c   :  { %1953 = vmatpush1.bf16.msra.mxu1 %v4267_v19 }
 0x22d   :  { %1954 = vmatprep.subr.bf16.mxu1 %v4272_v30  ;;  %v4318_v30 = vld [vmem:[#allocation14 + $0x1e0] ss:$8 sps:$4 sm:$0xff]  }
 0x230   :  { %1955 = vmatpush1.bf16.msra.mxu1 %v4270_v31  ;;  %v4323_v31 = vld [vmem:[#allocation14 + $0x1f4] ss:$8 sps:$4 sm:$0xff]  }
 0x231   :  { %1956 = vmatprep.subr.bf16.mxu1 %v4275_v32  ;;  %v4321_v32 = vld [vmem:[#allocation14 + $0x1f0] ss:$8 sps:$4 sm:$0xff]  }
 0x234   :  { %1957 = vmatpush1.bf16.msra.mxu1 %v4273_v33  ;;  %v4324_v33 = vld [vmem:[#allocation14 + $0x200] ss:$8 sps:$4 sm:$0xff]  }
 0x249   :  { %v507_v40 = vpop.f32.mrb[0].mxu0  ;;  %v595_v41 = vpop.f32.mrb[0].mxu1 }
 0x24a   :  { %v596_v43 = vadd.f32 %v595_v41, %v507_v40  ;;  %v3944_v44 = vpop.f32.mrb[1].mxu0  ;;  %v3964_v45 = vpop.f32.mrb[1].mxu1  ;;  %v4276_v40 = vld [vmem:[#allocation14 + $0x100] ss:$8 sps:$4 sm:$0xff]   ;;  %v4278_v41 = vld [vmem:[#allocation14 + $0x104] ss:$8 sps:$4 sm:$0xff]  }
 0x24b   :  { %v510_v46 = vpop.f32.mrb[2].mxu0  ;;  %v598_v47 = vpop.f32.mrb[2].mxu1  ;;  %v4281_v45 = vld [vmem:[#allocation14 + $0x114] ss:$8 sps:$4 sm:$0xff]   ;;  %2177 = vmatprep.subr.bf16.mxu0 %v4278_v41  ;;  %v4333_v41 = vld [vmem:[#allocation14 + $0x230] ss:$8 sps:$4 sm:$0xff]  }
 0x24c   :  { %v608_v48 = vadd.f32 %v3533_v42, %v596_v43  ;;  %v3945_v49 = vpop.f32.mrb[3].mxu0  ;;  %v3965_v50 = vpop.f32.mrb[3].mxu1 }
 0x24d   :  { %v4279_v50 = vld [vmem:[#allocation14 + $0x110] ss:$8 sps:$4 sm:$0xff]  }
 0x24e   :  { %v3534_v53 = vmul.f32 -1.442695, %v608_v48 }
 0x250   :  { %4574 = vpow2.f32 %v3534_v53  ;;  %v4287_v53 = vld [vmem:[#allocation14 + $0x134] ss:$8 sps:$4 sm:$0xff]  }
 0x25a   :  { %v4575_v61 = vpop.eup %4574 }
 0x25b   :  { %v612_v62 = vadd.f32 1.0, %v4575_v61  ;;  %v4299_v61 = vld [vmem:[#allocation14 + $0x174] ss:$8 sps:$4 sm:$0xff]  }
 0x25d   :  { %4576 = vrcp.f32 %v612_v62  ;;  %v4297_v62 = vld [vmem:[#allocation14 + $0x170] ss:$8 sps:$4 sm:$0xff]  }
 0x267   :  { %v4577_v5 = vpop.eup %4576 }
 0x268   :  { %v615_v6 = vmul.f32 %v4577_v5, %v608_v48  ;;  %v4311_v5 = vld [vmem:[#allocation14 + $0x1b4] ss:$8 sps:$4 sm:$0xff]  }
 0x26a   :  { %v1564_v9 = vpack.c.bf16 %v615_v6, %v615_v6  ;;  %v4309_v6 = vld [vmem:[#allocation14 + $0x1b0] ss:$8 sps:$4 sm:$0xff]  }
 0x26c   :  { %1694 = vmatmul.mubr.bf16.vlgmr.msra.gmra.mrb[12].mxu0 %v1564_v9  ;;  %v4317_v9 = vld [vmem:[#allocation14 + $0x1d4] ss:$8 sps:$4 sm:$0xff]  }
 0x26d   :  { %2178 = vmatpush1.bf16.msra.mxu0 %v4276_v40  ;;  %v4335_v40 = vld [vmem:[#allocation14 + $0x234] ss:$8 sps:$4 sm:$0xff]  }
 0x26e   :  { %2179 = vmatprep.subr.bf16.mxu0 %v4281_v45  ;;  %v4339_v45 = vld [vmem:[#allocation14 + $0x250] ss:$8 sps:$4 sm:$0xff]  }
 0x271   :  { %2180 = vmatpush1.bf16.msra.mxu0 %v4279_v50  ;;  %v4350_v50 = vld [vmem:[#allocation14 + $0x284] ss:$8 sps:$4 sm:$0xff]  }
 0x272   :  { %2181 = vmatprep.subr.bf16.mxu0 %v4284_v51  ;;  %v4348_v51 = vld [vmem:[#allocation14 + $0x280] ss:$8 sps:$4 sm:$0xff]  }
 0x275   :  { %2182 = vmatpush1.bf16.msra.mxu0 %v4282_v52  ;;  %v4353_v52 = vld [vmem:[#allocation14 + $0x294] ss:$8 sps:$4 sm:$0xff]  }
 0x276   :  { %2183 = vmatprep.subr.bf16.mxu0 %v4287_v53  ;;  %v4351_v53 = vld [vmem:[#allocation14 + $0x290] ss:$8 sps:$4 sm:$0xff]  }
 0x279   :  { %2184 = vmatpush1.bf16.msra.mxu0 %v4285_v54  ;;  %v4356_v54 = vld [vmem:[#allocation14 + $0x2a4] ss:$8 sps:$4 sm:$0xff]  }
 0x27a   :  { %2185 = vmatprep.subr.bf16.mxu0 %v4290_v55  ;;  %v4354_v55 = vld [vmem:[#allocation14 + $0x2a0] ss:$8 sps:$4 sm:$0xff]  }
 0x27d   :  { %2186 = vmatpush1.bf16.msra.mxu0 %v4288_v56  ;;  %v4359_v56 = vld [vmem:[#allocation14 + $0x2b4] ss:$8 sps:$4 sm:$0xff]  }
 0x27e   :  { %2187 = vmatprep.subr.bf16.mxu0 %v4293_v57  ;;  %v4357_v57 = vld [vmem:[#allocation14 + $0x2b0] ss:$8 sps:$4 sm:$0xff]  }
 0x281   :  { %2188 = vmatpush1.bf16.msra.mxu0 %v4291_v58  ;;  %v4362_v58 = vld [vmem:[#allocation14 + $0x2c4] ss:$8 sps:$4 sm:$0xff]  }
 0x282   :  { %2189 = vmatprep.subr.bf16.mxu0 %v4296_v59  ;;  %v4360_v59 = vld [vmem:[#allocation14 + $0x2c0] ss:$8 sps:$4 sm:$0xff]  }
 0x285   :  { %2190 = vmatpush1.bf16.msra.mxu0 %v4294_v60  ;;  %v4365_v60 = vld [vmem:[#allocation14 + $0x2d4] ss:$8 sps:$4 sm:$0xff]  }
 0x286   :  { %2191 = vmatprep.subr.bf16.mxu0 %v4299_v61  ;;  %v4363_v61 = vld [vmem:[#allocation14 + $0x2d0] ss:$8 sps:$4 sm:$0xff]  }
 0x289   :  { %v1114_v20 = vpop.f32.mrb[4].mxu0  ;;  %v1155_v21 = vpop.f32.mrb[4].mxu1  ;;  %2192 = vmatpush1.bf16.msra.mxu0 %v4297_v62  ;;  %v1754_v62 = vld [vmem:[%s5169_s12] sm:$0x3] }
 0x28a   :  { %v1116_v22 = vpop.f32.mrb[5].mxu0  ;;  %v1156_v23 = vadd.f32 %v1155_v21, %v1114_v20  ;;  %v1157_v24 = vpop.f32.mrb[5].mxu1  ;;  %2193 = vmatprep.subr.bf16.mxu0 %v4302_v39  ;;  %v1759_v39 = vrot.slane %v1754_v62, %v5101_v13 }
 0x28b   :  { %v1118_v25 = vpop.f32.mrb[6].mxu0  ;;  %v1158_v26 = vadd.f32 %v1157_v24, %v1116_v22  ;;  %v1159_v27 = vpop.f32.mrb[6].mxu1 }
 0x28c   :  { %v1119_v28 = vpop.f32.mrb[7].mxu0  ;;  %v1160_v29 = vpop.f32.mrb[7].mxu1 }
 0x28d   :  { %2194 = vmatpush1.bf16.msra.mxu0 %v4300_v63  ;;  %v4320_v29 = vld [vmem:[#allocation14 + $0x1e4] ss:$8 sps:$4 sm:$0xff]   ;;  %v1763_v63 = vrot.slane %v1754_v62, %v5107_v15  ;;  %v4417_v62 = vld [vmem:[#allocation14 + $0x3f0] ss:$8 sps:$4 sm:$0xff]  }
 0x28e   :  { %2195 = vmatprep.subr.bf16.mxu0 %v4305_v1 }
 0x291   :  { %2196 = vmatpush1.bf16.msra.mxu0 %v4303_v2 }
 0x292   :  { %2197 = vmatprep.subr.bf16.mxu0 %v4308_v3 }
 0x295   :  { %2198 = vmatpush1.bf16.msra.mxu0 %v4306_v4 }
 0x296   :  { %2199 = vmatprep.subr.bf16.mxu0 %v4311_v5 }
 0x299   :  { %2200 = vmatpush1.bf16.msra.mxu0 %v4309_v6 }
 0x29a   :  { %2201 = vmatprep.subr.bf16.mxu0 %v4314_v7 }
 0x29d   :  { %2202 = vmatpush1.bf16.msra.mxu0 %v4312_v8 }
 0x29e   :  { %2203 = vmatprep.subr.bf16.mxu0 %v4317_v9 }
 0x2a1   :  { %2204 = vmatpush1.bf16.msra.mxu0 %v4315_v10 }
 0x2a2   :  { %2205 = vmatprep.subr.bf16.mxu0 %v4320_v29  ;;  %v4392_v29 = vld [vmem:[#allocation14 + $0x364] ss:$8 sps:$4 sm:$0xff]  }
 0x2a5   :  { %2206 = vmatpush1.bf16.msra.mxu0 %v4318_v30  ;;  %v4390_v30 = vld [vmem:[#allocation14 + $0x360] ss:$8 sps:$4 sm:$0xff]  }
 0x2a6   :  { %2207 = vmatprep.subr.bf16.mxu0 %v4323_v31  ;;  %v4395_v31 = vld [vmem:[#allocation14 + $0x374] ss:$8 sps:$4 sm:$0xff]  }
 0x2a9   :  { %2208 = vmatpush1.bf16.msra.mxu0 %v4321_v32  ;;  %v4393_v32 = vld [vmem:[#allocation14 + $0x370] ss:$8 sps:$4 sm:$0xff]  }
 0x2c9   :  { %v1516_v35 = vpop.f32.mrb[8].mxu0  ;;  %v1557_v36 = vpop.f32.mrb[8].mxu1 }
 0x2ca   :  { %v1517_v0 = vadd.f32 %v1516_v35, %v1156_v23  ;;  %v1518_v37 = vpop.f32.mrb[9].mxu0  ;;  %v1559_v38 = vpop.f32.mrb[9].mxu1  ;;  %v4326_v35 = vld [vmem:[#allocation14 + $0x204] ss:$8 sps:$4 sm:$0xff]  }
 0x2cb   :  { %v1519_v42 = vadd.f32 %v1518_v37, %v1158_v26  ;;  %v1520_v43 = vpop.f32.mrb[10].mxu0  ;;  %v1561_v44 = vpop.f32.mrb[10].mxu1  ;;  %2428 = vmatprep.subr.bf16.mxu1 %v4326_v35  ;;  %v4332_v37 = vld [vmem:[#allocation14 + $0x224] ss:$8 sps:$4 sm:$0xff]   ;;  %v4396_v35 = vld [vmem:[#allocation14 + $0x380] ss:$8 sps:$4 sm:$0xff]  }
 0x2cc   :  { %v5094_v46 = vadd.f32 %v1557_v36, %v1517_v0  ;;  %v1521_v47 = vpop.f32.mrb[11].mxu0  ;;  %v1562_v48 = vpop.f32.mrb[11].mxu1  ;;  %v4329_v36 = vld [vmem:[#allocation14 + $0x214] ss:$8 sps:$4 sm:$0xff]   ;;  %v4327_v0 = vld [vmem:[#allocation14 + $0x210] ss:$8 sps:$4 sm:$0xff]  }
 0x2cd   :  { %v5096_v49 = vadd.f32 %v1559_v38, %v1519_v42  ;;  %v4330_v38 = vld [vmem:[#allocation14 + $0x220] ss:$8 sps:$4 sm:$0xff]   ;;  %v4338_v42 = vld [vmem:[#allocation14 + $0x244] ss:$8 sps:$4 sm:$0xff]   ;;  %v4341_v44 = vld [vmem:[#allocation14 + $0x254] ss:$8 sps:$4 sm:$0xff]  }
 0x2ce   :  { %v4336_v43 = vld [vmem:[#allocation14 + $0x240] ss:$8 sps:$4 sm:$0xff]   ;;  %v4347_v48 = vld [vmem:[#allocation14 + $0x274] ss:$8 sps:$4 sm:$0xff]  }
 0x2cf   :  { %v4342_v47 = vld [vmem:[#allocation14 + $0x260] ss:$8 sps:$4 sm:$0xff]  }
 0x33f   :  { %v1695_v34 = vpop.f32.mrb[12].mxu0 }
 0x340   :  { %v1702_v18 = vadd.f32 %v1695_v34, %v5094_v46  ;;  %v1697_v19 = vpop.f32.mrb[13].mxu0  ;;  %v4344_v46 = vld [vmem:[#allocation14 + $0x264] ss:$8 sps:$4 sm:$0xff]   ;;  %v4369_v34 = vld [vmem:[#allocation14 + $0x2f0] ss:$8 sps:$4 sm:$0xff]  }
 0x341   :  { %v1703_v20 = vadd.f32 %v1697_v19, %v5096_v49  ;;  %v1699_v21 = vpop.f32.mrb[14].mxu0  ;;  %v4345_v49 = vld [vmem:[#allocation14 + $0x270] ss:$8 sps:$4 sm:$0xff]   ;;  %v4377_v19 = vld [vmem:[#allocation14 + $0x314] ss:$8 sps:$4 sm:$0xff]  }
 0x342   :  { %v1716_v22 = vadd.f32 %v1709_v16, %v1702_v18  ;;  %v1700_v23 = vpop.f32.mrb[15].mxu0  ;;  %v4371_v16 = vld [vmem:[#allocation14 + $0x2f4] ss:$8 sps:$4 sm:$0xff]   ;;  %v4374_v18 = vld [vmem:[#allocation14 + $0x304] ss:$8 sps:$4 sm:$0xff]  }
 0x343   :  { %v1717_v24 = vadd.f32 %v1713_v17, %v1703_v20  ;;  %v4372_v17 = vld [vmem:[#allocation14 + $0x300] ss:$8 sps:$4 sm:$0xff]   ;;  %2679 = vmatprep.subr.bf16.mxu0 %v4374_v18  ;;  %v4375_v20 = vld [vmem:[#allocation14 + $0x310] ss:$8 sps:$4 sm:$0xff]   ;;  %v4380_v21 = vld [vmem:[#allocation14 + $0x324] ss:$8 sps:$4 sm:$0xff]  }
 0x344   :  { %v1718_v25 = vmax.f32 %v1716_v22, 0.0  ;;  %v4378_v22 = vld [vmem:[#allocation14 + $0x320] ss:$8 sps:$4 sm:$0xff]   ;;  %v4383_v23 = vld [vmem:[#allocation14 + $0x334] ss:$8 sps:$4 sm:$0xff]  }
 0x345   :  { %v1719_v26 = vmax.f32 %v1717_v24, 0.0  ;;  %v4381_v24 = vld [vmem:[#allocation14 + $0x330] ss:$8 sps:$4 sm:$0xff]   ;;  %v4444_v18 = vld [vmem:[#allocation14 + $0x480] ss:$8 sps:$4 sm:$0xff]  }
 0x346   :  { %v1720_v28 = vpack.c.bf16 %v1718_v25, %v1718_v25  ;;  %v4386_v25 = vld [vmem:[#allocation14 + $0x344] ss:$8 sps:$4 sm:$0xff]  }
 0x347   :  { %v1721_v27 = vpack.c.bf16 %v1719_v26, %v1719_v26  ;;  %v4384_v26 = vld [vmem:[#allocation14 + $0x340] ss:$8 sps:$4 sm:$0xff]  }
 0x349   :  { %1958 = vmatprep.mubr.bf16.mxu1 %v1721_v27  ;;  %v4389_v27 = vld [vmem:[#allocation14 + $0x354] ss:$8 sps:$4 sm:$0xff]  }
 0x34a   :  { %1959 = vmatmul.mubr.bf16.vlgmr.msra.gmra.mrb[12].mxu1 %v1720_v28  ;;  %v4387_v28 = vld [vmem:[#allocation14 + $0x350] ss:$8 sps:$4 sm:$0xff]  }
 0x34b   :  { %2429 = vmatpush1.bf16.msra.mxu1 %v4324_v33  ;;  %v4398_v33 = vld [vmem:[#allocation14 + $0x384] ss:$8 sps:$4 sm:$0xff]  }
 0x34c   :  { %2430 = vmatprep.subr.bf16.mxu1 %v4329_v36  ;;  %v4401_v36 = vld [vmem:[#allocation14 + $0x394] ss:$8 sps:$4 sm:$0xff]  }
 0x34f   :  { %2431 = vmatpush1.bf16.msra.mxu1 %v4327_v0  ;;  %v4399_v0 = vld [vmem:[#allocation14 + $0x390] ss:$8 sps:$4 sm:$0xff]  }
 0x350   :  { %2432 = vmatprep.subr.bf16.mxu1 %v4332_v37  ;;  %v4404_v37 = vld [vmem:[#allocation14 + $0x3a4] ss:$8 sps:$4 sm:$0xff]  }
 0x353   :  { %2433 = vmatpush1.bf16.msra.mxu1 %v4330_v38  ;;  %v4402_v38 = vld [vmem:[#allocation14 + $0x3a0] ss:$8 sps:$4 sm:$0xff]  }
 0x354   :  { %2434 = vmatprep.subr.bf16.mxu1 %v4335_v40  ;;  %v4407_v40 = vld [vmem:[#allocation14 + $0x3b4] ss:$8 sps:$4 sm:$0xff]  }
 0x357   :  { %2435 = vmatpush1.bf16.msra.mxu1 %v4333_v41  ;;  %v4405_v41 = vld [vmem:[#allocation14 + $0x3b0] ss:$8 sps:$4 sm:$0xff]  }
 0x358   :  { %2436 = vmatprep.subr.bf16.mxu1 %v4338_v42  ;;  %v4410_v42 = vld [vmem:[#allocation14 + $0x3c4] ss:$8 sps:$4 sm:$0xff]  }
 0x35b   :  { %2437 = vmatpush1.bf16.msra.mxu1 %v4336_v43  ;;  %v4408_v43 = vld [vmem:[#allocation14 + $0x3c0] ss:$8 sps:$4 sm:$0xff]  }
 0x35c   :  { %2438 = vmatprep.subr.bf16.mxu1 %v4341_v44  ;;  %v4413_v44 = vld [vmem:[#allocation14 + $0x3d4] ss:$8 sps:$4 sm:$0xff]  }
 0x35f   :  { %2439 = vmatpush1.bf16.msra.mxu1 %v4339_v45  ;;  %v4411_v45 = vld [vmem:[#allocation14 + $0x3d0] ss:$8 sps:$4 sm:$0xff]  }
 0x360   :  { %2440 = vmatprep.subr.bf16.mxu1 %v4344_v46  ;;  %v3711_v46 = vld [vmem:[%s5169_s12 + $0x2] sm:$0x3] }
 0x363   :  { %2441 = vmatpush1.bf16.msra.mxu1 %v4342_v47  ;;  %v2010_v47 = vrot.slane %v3711_v46, %v5101_v13 }
 0x364   :  { %2442 = vmatprep.subr.bf16.mxu1 %v4347_v48  ;;  %v2014_v48 = vrot.slane %v3711_v46, %v5107_v15  ;;  %v4465_v46 = vld [vmem:[#allocation14 + $0x4f0] ss:$8 sps:$4 sm:$0xff]  }
 0x367   :  { %2443 = vmatpush1.bf16.msra.mxu1 %v4345_v49 }
 0x368   :  { %2444 = vmatprep.subr.bf16.mxu1 %v4350_v50 }
 0x36b   :  { %2445 = vmatpush1.bf16.msra.mxu1 %v4348_v51 }
 0x36c   :  { %2446 = vmatprep.subr.bf16.mxu1 %v4353_v52 }
 0x36f   :  { %2447 = vmatpush1.bf16.msra.mxu1 %v4351_v53 }
 0x370   :  { %2448 = vmatprep.subr.bf16.mxu1 %v4356_v54 }
 0x373   :  { %2449 = vmatpush1.bf16.msra.mxu1 %v4354_v55 }
 0x374   :  { %2450 = vmatprep.subr.bf16.mxu1 %v4359_v56 }
 0x377   :  { %2451 = vmatpush1.bf16.msra.mxu1 %v4357_v57 }
 0x378   :  { %2452 = vmatprep.subr.bf16.mxu1 %v4362_v58 }
 0x37b   :  { %2453 = vmatpush1.bf16.msra.mxu1 %v4360_v59  ;;  %v4416_v59 = vld [vmem:[#allocation14 + $0x3e4] ss:$8 sps:$4 sm:$0xff]  }
 0x37c   :  { %2454 = vmatprep.subr.bf16.mxu1 %v4365_v60  ;;  %v4414_v60 = vld [vmem:[#allocation14 + $0x3e0] ss:$8 sps:$4 sm:$0xff]  }
 0x37f   :  { %2455 = vmatpush1.bf16.msra.mxu1 %v4363_v61  ;;  %v4419_v61 = vld [vmem:[#allocation14 + $0x3f4] ss:$8 sps:$4 sm:$0xff]  }
 0x380   :  { %2456 = vmatprep.subr.bf16.mxu1 %v4368_v11  ;;  %v4440_v11 = vld [vmem:[#allocation14 + $0x464] ss:$8 sps:$4 sm:$0xff]  }
 0x383   :  { %2457 = vmatpush1.bf16.msra.mxu1 %v4366_v14  ;;  %v4438_v14 = vld [vmem:[#allocation14 + $0x460] ss:$8 sps:$4 sm:$0xff]  }
 0x384   :  { %2458 = vmatprep.subr.bf16.mxu1 %v4371_v16  ;;  %v4443_v16 = vld [vmem:[#allocation14 + $0x474] ss:$8 sps:$4 sm:$0xff]  }
 0x387   :  { %2459 = vmatpush1.bf16.msra.mxu1 %v4369_v34  ;;  %v4441_v34 = vld [vmem:[#allocation14 + $0x470] ss:$8 sps:$4 sm:$0xff]  }
 0x41d   :  { %v1960_v1 = vpop.f32.mrb[12].mxu1 }
 0x41e   :  { %v1961_v2 = vadd.f32 %v1960_v1, %v1759_v39  ;;  %v1962_v3 = vpop.f32.mrb[13].mxu1  ;;  %v4420_v39 = vld [vmem:[#allocation14 + $0x400] ss:$8 sps:$4 sm:$0xff]   ;;  %v4425_v1 = vld [vmem:[#allocation14 + $0x414] ss:$8 sps:$4 sm:$0xff]  }
 0x41f   :  { %v1963_v4 = vadd.f32 %v1962_v3, %v1763_v63  ;;  %v1964_v5 = vpop.f32.mrb[14].mxu1  ;;  %v4422_v63 = vld [vmem:[#allocation14 + $0x404] ss:$8 sps:$4 sm:$0xff]  }
 0x420   :  { %v1967_v6 = vmax.f32 %v1961_v2, 0.0  ;;  %v1965_v7 = vpop.f32.mrb[15].mxu1  ;;  %2930 = vmatprep.subr.bf16.mxu1 %v4422_v63  ;;  %v4423_v2 = vld [vmem:[#allocation14 + $0x410] ss:$8 sps:$4 sm:$0xff]   ;;  %v4428_v3 = vld [vmem:[#allocation14 + $0x424] ss:$8 sps:$4 sm:$0xff]  }
 0x421   :  { %v1968_v8 = vmax.f32 %v1963_v4, 0.0  ;;  %v4426_v4 = vld [vmem:[#allocation14 + $0x420] ss:$8 sps:$4 sm:$0xff]   ;;  %v4431_v5 = vld [vmem:[#allocation14 + $0x434] ss:$8 sps:$4 sm:$0xff]  }
 0x422   :  { %v1969_v10 = vpack.c.bf16 %v1967_v6, %v1967_v6  ;;  %v4429_v6 = vld [vmem:[#allocation14 + $0x430] ss:$8 sps:$4 sm:$0xff]   ;;  %v4434_v7 = vld [vmem:[#allocation14 + $0x444] ss:$8 sps:$4 sm:$0xff]  }
 0x423   :  { %v1970_v9 = vpack.c.bf16 %v1968_v8, %v1968_v8  ;;  %v4432_v8 = vld [vmem:[#allocation14 + $0x440] ss:$8 sps:$4 sm:$0xff]   ;;  %v4518_v63 = vld [vmem:[#allocation16 + $0x104] ss:$16 sps:$4 sm:$0xff]  }
 0x425   :  { %2209 = vmatprep.mubr.bf16.mxu0 %v1970_v9  ;;  %v4437_v9 = vld [vmem:[#allocation14 + $0x454] ss:$8 sps:$4 sm:$0xff]  }
 0x426   :  { %2210 = vmatmul.mubr.bf16.vlgmr.msra.gmra.mrb[16].mxu0 %v1969_v10  ;;  %v4435_v10 = vld [vmem:[#allocation14 + $0x450] ss:$8 sps:$4 sm:$0xff]  }
 0x427   :  { %2680 = vmatpush1.bf16.msra.mxu0 %v4372_v17  ;;  %v4446_v17 = vld [vmem:[#allocation14 + $0x484] ss:$8 sps:$4 sm:$0xff]  }
 0x428   :  { %2681 = vmatprep.subr.bf16.mxu0 %v4377_v19  ;;  %v4449_v19 = vld [vmem:[#allocation14 + $0x494] ss:$8 sps:$4 sm:$0xff]  }
 0x42b   :  { %2682 = vmatpush1.bf16.msra.mxu0 %v4375_v20  ;;  %v4447_v20 = vld [vmem:[#allocation14 + $0x490] ss:$8 sps:$4 sm:$0xff]  }
 0x42c   :  { %2683 = vmatprep.subr.bf16.mxu0 %v4380_v21  ;;  %v4452_v21 = vld [vmem:[#allocation14 + $0x4a4] ss:$8 sps:$4 sm:$0xff]  }
 0x42f   :  { %2684 = vmatpush1.bf16.msra.mxu0 %v4378_v22  ;;  %v4450_v22 = vld [vmem:[#allocation14 + $0x4a0] ss:$8 sps:$4 sm:$0xff]  }
 0x430   :  { %2685 = vmatprep.subr.bf16.mxu0 %v4383_v23  ;;  %v4455_v23 = vld [vmem:[#allocation14 + $0x4b4] ss:$8 sps:$4 sm:$0xff]  }
 0x433   :  { %2686 = vmatpush1.bf16.msra.mxu0 %v4381_v24  ;;  %v4453_v24 = vld [vmem:[#allocation14 + $0x4b0] ss:$8 sps:$4 sm:$0xff]  }
 0x434   :  { %2687 = vmatprep.subr.bf16.mxu0 %v4386_v25  ;;  %v4458_v25 = vld [vmem:[#allocation14 + $0x4c4] ss:$8 sps:$4 sm:$0xff]  }
 0x437   :  { %2688 = vmatpush1.bf16.msra.mxu0 %v4384_v26  ;;  %v4456_v26 = vld [vmem:[#allocation14 + $0x4c0] ss:$8 sps:$4 sm:$0xff]  }
 0x438   :  { %2689 = vmatprep.subr.bf16.mxu0 %v4389_v27  ;;  %v4461_v27 = vld [vmem:[#allocation14 + $0x4d4] ss:$8 sps:$4 sm:$0xff]  }
 0x43b   :  { %2690 = vmatpush1.bf16.msra.mxu0 %v4387_v28  ;;  %v4459_v28 = vld [vmem:[#allocation14 + $0x4d0] ss:$8 sps:$4 sm:$0xff]  }
 0x43c   :  { %2691 = vmatprep.subr.bf16.mxu0 %v4392_v29  ;;  %v3744_v29 = vld [vmem:[%s5169_s12 + $0x4] sm:$0x3] }
 0x43f   :  { %2692 = vmatpush1.bf16.msra.mxu0 %v4390_v30  ;;  %v2261_v30 = vrot.slane %v3744_v29, %v5101_v13 }
 0x440   :  { %2693 = vmatprep.subr.bf16.mxu0 %v4395_v31  ;;  %v2265_v31 = vrot.slane %v3744_v29, %v5107_v15  ;;  %v4477_v29 = vld [vmem:[#allocation16 + $0x28] ss:$16 sps:$4 sm:$0xff]  }
 0x443   :  { %2694 = vmatpush1.bf16.msra.mxu0 %v4393_v32 }
 0x444   :  { %2695 = vmatprep.subr.bf16.mxu0 %v4398_v33 }
 0x447   :  { %2696 = vmatpush1.bf16.msra.mxu0 %v4396_v35 }
 0x448   :  { %2697 = vmatprep.subr.bf16.mxu0 %v4401_v36 }
 0x44b   :  { %2698 = vmatpush1.bf16.msra.mxu0 %v4399_v0 }
 0x44c   :  { %2699 = vmatprep.subr.bf16.mxu0 %v4404_v37 }
 0x44f   :  { %2700 = vmatpush1.bf16.msra.mxu0 %v4402_v38 }
 0x450   :  { %2701 = vmatprep.subr.bf16.mxu0 %v4407_v40 }
 0x453   :  { %2702 = vmatpush1.bf16.msra.mxu0 %v4405_v41 }
 0x454   :  { %2703 = vmatprep.subr.bf16.mxu0 %v4410_v42 }
 0x457   :  { %2704 = vmatpush1.bf16.msra.mxu0 %v4408_v43  ;;  %v4464_v43 = vld [vmem:[#allocation14 + $0x4e4] ss:$8 sps:$4 sm:$0xff]  }
 0x458   :  { %2705 = vmatprep.subr.bf16.mxu0 %v4413_v44  ;;  %v4462_v44 = vld [vmem:[#allocation14 + $0x4e0] ss:$8 sps:$4 sm:$0xff]  }
 0x45b   :  { %2706 = vmatpush1.bf16.msra.mxu0 %v4411_v45  ;;  %v4467_v45 = vld [vmem:[#allocation14 + $0x4f4] ss:$8 sps:$4 sm:$0xff]  }
 0x45c   :  { %2707 = vmatprep.subr.bf16.mxu0 %v4416_v59  ;;  %v4498_v59 = vld [vmem:[#allocation16 + $0xa0] ss:$16 sps:$4 sm:$0xff]  }
 0x45f   :  { %2708 = vmatpush1.bf16.msra.mxu0 %v4414_v60  ;;  %v4506_v60 = vld [vmem:[#allocation16 + $0xc4] ss:$16 sps:$4 sm:$0xff]  }
 0x460   :  { %2709 = vmatprep.subr.bf16.mxu0 %v4419_v61  ;;  %v4504_v61 = vld [vmem:[#allocation16 + $0xc0] ss:$16 sps:$4 sm:$0xff]  }
 0x463   :  { %2710 = vmatpush1.bf16.msra.mxu0 %v4417_v62  ;;  %v4512_v62 = vld [vmem:[#allocation16 + $0xe4] ss:$16 sps:$4 sm:$0xff]  }
 0x4f9   :  { %v2211_v49 = vpop.f32.mrb[16].mxu0 }
 0x4fa   :  { %v2212_v50 = vadd.f32 %v2211_v49, %v2010_v47  ;;  %v2213_v51 = vpop.f32.mrb[17].mxu0  ;;  %v4468_v47 = vld [vmem:[#allocation16] ss:$16 sps:$4 sm:$0xff]   ;;  %v4473_v49 = vld [vmem:[#allocation16 + $0xc] ss:$16 sps:$4 sm:$0xff]  }
 0x4fb   :  { %v2214_v52 = vadd.f32 %v2213_v51, %v2014_v48  ;;  %v2215_v53 = vpop.f32.mrb[18].mxu0  ;;  %v4470_v48 = vld [vmem:[#allocation16 + $0x4] ss:$16 sps:$4 sm:$0xff]   ;;  %v4474_v51 = vld [vmem:[#allocation16 + $0x20] ss:$16 sps:$4 sm:$0xff]  }
 0x4fc   :  { %v2218_v54 = vmax.f32 %v2212_v50, 0.0  ;;  %v2216_v55 = vpop.f32.mrb[19].mxu0  ;;  %v4476_v50 = vld [vmem:[#allocation16 + $0x24] ss:$16 sps:$4 sm:$0xff]   ;;  %3381 = vmatprep.subr.bf16.mxu0 %v4470_v48  ;;  %v4480_v53 = vld [vmem:[#allocation16 + $0x40] ss:$16 sps:$4 sm:$0xff]  }
 0x4fd   :  { %v2219_v56 = vmax.f32 %v2214_v52, 0.0  ;;  %v4482_v52 = vld [vmem:[#allocation16 + $0x44] ss:$16 sps:$4 sm:$0xff]   ;;  %v4486_v55 = vld [vmem:[#allocation16 + $0x60] ss:$16 sps:$4 sm:$0xff]  }
 0x4fe   :  { %v2220_v58 = vpack.c.bf16 %v2218_v54, %v2218_v54  ;;  %v4488_v54 = vld [vmem:[#allocation16 + $0x64] ss:$16 sps:$4 sm:$0xff]   ;;  %v4531_v48 = vld [vmem:[#allocation16 + $0x148] ss:$16 sps:$4 sm:$0xff]  }
 0x4ff   :  { %v2221_v57 = vpack.c.bf16 %v2219_v56, %v2219_v56  ;;  %v4494_v56 = vld [vmem:[#allocation16 + $0x84] ss:$16 sps:$4 sm:$0xff]  }
 0x501   :  { %2460 = vmatprep.mubr.bf16.mxu1 %v2221_v57  ;;  %v4492_v57 = vld [vmem:[#allocation16 + $0x80] ss:$16 sps:$4 sm:$0xff]  }
 0x502   :  { %2461 = vmatmul.mubr.bf16.vlgmr.msra.gmra.mrb[16].mxu1 %v2220_v58  ;;  %v4500_v58 = vld [vmem:[#allocation16 + $0xa4] ss:$16 sps:$4 sm:$0xff]  }
 0x503   :  { %2931 = vmatpush1.bf16.msra.mxu1 %v4420_v39  ;;  %v4510_v39 = vld [vmem:[#allocation16 + $0xe0] ss:$16 sps:$4 sm:$0xff]  }
 0x504   :  { %2932 = vmatprep.subr.bf16.mxu1 %v4425_v1  ;;  %v4516_v1 = vld [vmem:[#allocation16 + $0x100] ss:$16 sps:$4 sm:$0xff]  }
 0x507   :  { %2933 = vmatpush1.bf16.msra.mxu1 %v4423_v2  ;;  %v4524_v2 = vld [vmem:[#allocation16 + $0x124] ss:$16 sps:$4 sm:$0xff]  }
 0x508   :  { %2934 = vmatprep.subr.bf16.mxu1 %v4428_v3  ;;  %v4522_v3 = vld [vmem:[#allocation16 + $0x120] ss:$16 sps:$4 sm:$0xff]  }
 0x50b   :  { %2935 = vmatpush1.bf16.msra.mxu1 %v4426_v4  ;;  %v4530_v4 = vld [vmem:[#allocation16 + $0x144] ss:$16 sps:$4 sm:$0xff]  }
 0x50c   :  { %2936 = vmatprep.subr.bf16.mxu1 %v4431_v5  ;;  %v4528_v5 = vld [vmem:[#allocation16 + $0x140] ss:$16 sps:$4 sm:$0xff]  }
 0x50f   :  { %2937 = vmatpush1.bf16.msra.mxu1 %v4429_v6  ;;  %v4536_v6 = vld [vmem:[#allocation16 + $0x164] ss:$16 sps:$4 sm:$0xff]  }
 0x510   :  { %2938 = vmatprep.subr.bf16.mxu1 %v4434_v7  ;;  %v4534_v7 = vld [vmem:[#allocation16 + $0x160] ss:$16 sps:$4 sm:$0xff]  }
 0x513   :  { %2939 = vmatpush1.bf16.msra.mxu1 %v4432_v8  ;;  %v4542_v8 = vld [vmem:[#allocation16 + $0x184] ss:$16 sps:$4 sm:$0xff]  }
 0x514   :  { %2940 = vmatprep.subr.bf16.mxu1 %v4437_v9  ;;  %v4540_v9 = vld [vmem:[#allocation16 + $0x180] ss:$16 sps:$4 sm:$0xff]  }
 0x517   :  { %2941 = vmatpush1.bf16.msra.mxu1 %v4435_v10  ;;  %v4548_v10 = vld [vmem:[#allocation16 + $0x1a4] ss:$16 sps:$4 sm:$0xff]  }
 0x518   :  { %2942 = vmatprep.subr.bf16.mxu1 %v4440_v11  ;;  %v4546_v11 = vld [vmem:[#allocation16 + $0x1a0] ss:$16 sps:$4 sm:$0xff]  }
 0x51b   :  { %2943 = vmatpush1.bf16.msra.mxu1 %v4438_v14  ;;  %v3777_v14 = vld [vmem:[%s5169_s12 + $0x6] sm:$0x3] }
 0x51c   :  { %2944 = vmatprep.subr.bf16.mxu1 %v4443_v16  ;;  %v2512_v16 = vrot.slane %v3777_v14, %v5101_v13 }
 0x51f   :  { %2945 = vmatpush1.bf16.msra.mxu1 %v4441_v34  ;;  %v2516_v34 = vrot.slane %v3777_v14, %v5107_v15  ;;  %v3051_v14 = vsub.s32 2, %v5098_v12 }
 0x520   :  { %2946 = vmatprep.subr.bf16.mxu1 %v4446_v17 }
 0x523   :  { %2947 = vmatpush1.bf16.msra.mxu1 %v4444_v18 }
 0x524   :  { %2948 = vmatprep.subr.bf16.mxu1 %v4449_v19 }
 0x527   :  { %2949 = vmatpush1.bf16.msra.mxu1 %v4447_v20 }
 0x528   :  { %2950 = vmatprep.subr.bf16.mxu1 %v4452_v21 }
 0x52b   :  { %2951 = vmatpush1.bf16.msra.mxu1 %v4450_v22 }
 0x52c   :  { %2952 = vmatprep.subr.bf16.mxu1 %v4455_v23 }
 0x52f   :  { %2953 = vmatpush1.bf16.msra.mxu1 %v4453_v24 }
 0x530   :  { %2954 = vmatprep.subr.bf16.mxu1 %v4458_v25 }
 0x533   :  { %2955 = vmatpush1.bf16.msra.mxu1 %v4456_v26  ;;  %v4471_v26 = vld [vmem:[#allocation16 + $0x8] ss:$16 sps:$4 sm:$0xff]  }
 0x534   :  { %2956 = vmatprep.subr.bf16.mxu1 %v4461_v27 }
 0x537   :  { %2957 = vmatpush1.bf16.msra.mxu1 %v4459_v28  ;;  %v4479_v28 = vld [vmem:[#allocation16 + $0x2c] ss:$16 sps:$4 sm:$0xff]  }
 0x538   :  { %2958 = vmatprep.subr.bf16.mxu1 %v4464_v43  ;;  %v4521_v43 = vld [vmem:[#allocation16 + $0x10c] ss:$16 sps:$4 sm:$0xff]  }
 0x53b   :  { %2959 = vmatpush1.bf16.msra.mxu1 %v4462_v44  ;;  %v4519_v44 = vld [vmem:[#allocation16 + $0x108] ss:$16 sps:$4 sm:$0xff]  }
 0x53c   :  { %2960 = vmatprep.subr.bf16.mxu1 %v4467_v45  ;;  %v4527_v45 = vld [vmem:[#allocation16 + $0x12c] ss:$16 sps:$4 sm:$0xff]  }
 0x53f   :  { %2961 = vmatpush1.bf16.msra.mxu1 %v4465_v46  ;;  %v4525_v46 = vld [vmem:[#allocation16 + $0x128] ss:$16 sps:$4 sm:$0xff]  }
 0x540   :  { %3422 = vmatprep.subr.bf16.mxu1 %v4473_v49  ;;  %v4539_v49 = vld [vmem:[#allocation16 + $0x16c] ss:$16 sps:$4 sm:$0xff]  }
 0x5d5   :  { %v2462_v32 = vpop.f32.mrb[16].mxu1 }
 0x5d6   :  { %v2463_v33 = vadd.f32 %v2462_v32, %v2261_v30  ;;  %v2464_v35 = vpop.f32.mrb[17].mxu1  ;;  %v4485_v30 = vld [vmem:[#allocation16 + $0x4c] ss:$16 sps:$4 sm:$0xff]  }
 0x5d7   :  { %v2465_v36 = vadd.f32 %v2464_v35, %v2265_v31  ;;  %v2466_v0 = vpop.f32.mrb[18].mxu1  ;;  %v4483_v31 = vld [vmem:[#allocation16 + $0x48] ss:$16 sps:$4 sm:$0xff]   ;;  %v4491_v32 = vld [vmem:[#allocation16 + $0x6c] ss:$16 sps:$4 sm:$0xff]  }
 0x5d8   :  { %v2469_v37 = vmax.f32 %v2463_v33, 0.0  ;;  %v2467_v38 = vpop.f32.mrb[19].mxu1  ;;  %v4489_v33 = vld [vmem:[#allocation16 + $0x68] ss:$16 sps:$4 sm:$0xff]   ;;  %v4497_v35 = vld [vmem:[#allocation16 + $0x8c] ss:$16 sps:$4 sm:$0xff]  }
 0x5d9   :  { %v2470_v40 = vmax.f32 %v2465_v36, 0.0  ;;  %v4495_v36 = vld [vmem:[#allocation16 + $0x88] ss:$16 sps:$4 sm:$0xff]   ;;  %v4503_v0 = vld [vmem:[#allocation16 + $0xac] ss:$16 sps:$4 sm:$0xff]  }
 0x5da   :  { %v2471_v42 = vpack.c.bf16 %v2469_v37, %v2469_v37  ;;  %v4501_v37 = vld [vmem:[#allocation16 + $0xa8] ss:$16 sps:$4 sm:$0xff]   ;;  %v4509_v38 = vld [vmem:[#allocation16 + $0xcc] ss:$16 sps:$4 sm:$0xff]  }
 0x5db   :  { %v2472_v41 = vpack.c.bf16 %v2470_v40, %v2470_v40  ;;  %v4507_v40 = vld [vmem:[#allocation16 + $0xc8] ss:$16 sps:$4 sm:$0xff]  }
 0x5dd   :  { %2711 = vmatprep.mubr.bf16.mxu0 %v2472_v41  ;;  %v4515_v41 = vld [vmem:[#allocation16 + $0xec] ss:$16 sps:$4 sm:$0xff]  }
 0x5de   :  { %2712 = vmatmul.mubr.bf16.vlgmr.msra.gmra.mrb[20].mxu0 %v2471_v42  ;;  %v4513_v42 = vld [vmem:[#allocation16 + $0xe8] ss:$16 sps:$4 sm:$0xff]  }
 0x5df   :  { %3382 = vmatpush1.bf16.msra.mxu0 %v4468_v47  ;;  %v4533_v47 = vld [vmem:[#allocation16 + $0x14c] ss:$16 sps:$4 sm:$0xff]  }
 0x5e0   :  { %3383 = vmatprep.subr.bf16.mxu0 %v4476_v50  ;;  %v4537_v50 = vld [vmem:[#allocation16 + $0x168] ss:$16 sps:$4 sm:$0xff]  }
 0x5e3   :  { %3384 = vmatpush1.bf16.msra.mxu0 %v4474_v51  ;;  %v4545_v51 = vld [vmem:[#allocation16 + $0x18c] ss:$16 sps:$4 sm:$0xff]  }
 0x5e4   :  { %3385 = vmatprep.subr.bf16.mxu0 %v4482_v52  ;;  %v4543_v52 = vld [vmem:[#allocation16 + $0x188] ss:$16 sps:$4 sm:$0xff]  }
 0x5e7   :  { %3386 = vmatpush1.bf16.msra.mxu0 %v4480_v53  ;;  %v4551_v53 = vld [vmem:[#allocation16 + $0x1ac] ss:$16 sps:$4 sm:$0xff]  }
 0x5e8   :  { %3387 = vmatprep.subr.bf16.mxu0 %v4488_v54  ;;  %v4549_v54 = vld [vmem:[#allocation16 + $0x1a8] ss:$16 sps:$4 sm:$0xff]  }
 0x5eb   :  { %3388 = vmatpush1.bf16.msra.mxu0 %v4486_v55  ;;  %v4554_v55 = vld [vmem:[#allocation16 + $0x1c4] ss:$16 sps:$4 sm:$0xff]  }
 0x5ec   :  { %3389 = vmatprep.subr.bf16.mxu0 %v4494_v56  ;;  %v4557_v56 = vld [vmem:[#allocation16 + $0x1cc] ss:$16 sps:$4 sm:$0xff]  }
 0x5ef   :  { %3390 = vmatpush1.bf16.msra.mxu0 %v4492_v57  ;;  %v4552_v57 = vld [vmem:[#allocation16 + $0x1c0] ss:$16 sps:$4 sm:$0xff]  }
 0x5f0   :  { %3391 = vmatprep.subr.bf16.mxu0 %v4500_v58  ;;  %v4555_v58 = vld [vmem:[#allocation16 + $0x1c8] ss:$16 sps:$4 sm:$0xff]  }
 0x5f3   :  { %3392 = vmatpush1.bf16.msra.mxu0 %v4498_v59  ;;  %v4560_v59 = vld [vmem:[#allocation16 + $0x1e4] ss:$16 sps:$4 sm:$0xff]  }
 0x5f4   :  { %3393 = vmatprep.subr.bf16.mxu0 %v4506_v60  ;;  %v4563_v60 = vld [vmem:[#allocation16 + $0x1ec] ss:$16 sps:$4 sm:$0xff]  }
 0x5f7   :  { %3394 = vmatpush1.bf16.msra.mxu0 %v4504_v61  ;;  %v4558_v61 = vld [vmem:[#allocation16 + $0x1e0] ss:$16 sps:$4 sm:$0xff]  }
 0x5f8   :  { %3395 = vmatprep.subr.bf16.mxu0 %v4512_v62  ;;  %v4561_v62 = vld [vmem:[#allocation16 + $0x1e8] ss:$16 sps:$4 sm:$0xff]  }
 0x5fb   :  { %3396 = vmatpush1.bf16.msra.mxu0 %v4510_v39  ;;  %v3810_v39 = vld [vmem:[%s5169_s12 + $0x8] sm:$0x3] }
 0x5fc   :  { %3397 = vmatprep.subr.bf16.mxu0 %v4518_v63  ;;  %v2763_v63 = vrot.slane %v3810_v39, %v5101_v13 }
 0x5ff   :  { %3398 = vmatpush1.bf16.msra.mxu0 %v4516_v1  ;;  %v2767_v1 = vrot.slane %v3810_v39, %v5107_v15 }
 0x600   :  { %3399 = vmatprep.subr.bf16.mxu0 %v4524_v2 }
 0x603   :  { %3400 = vmatpush1.bf16.msra.mxu0 %v4522_v3 }
 0x604   :  { %3401 = vmatprep.subr.bf16.mxu0 %v4530_v4 }
 0x607   :  { %3402 = vmatpush1.bf16.msra.mxu0 %v4528_v5 }
 0x608   :  { %3403 = vmatprep.subr.bf16.mxu0 %v4536_v6 }
 0x60b   :  { %3404 = vmatpush1.bf16.msra.mxu0 %v4534_v7 }
 0x60c   :  { %3405 = vmatprep.subr.bf16.mxu0 %v4542_v8 }
 0x60f   :  { %3406 = vmatpush1.bf16.msra.mxu0 %v4540_v9 }
 0x610   :  { %3407 = vmatprep.subr.bf16.mxu0 %v4548_v10 }
 0x613   :  { %3408 = vmatpush1.bf16.msra.mxu0 %v4546_v11 }
 0x614   :  { %3409 = vmatprep.subr.bf16.mxu0 %v4554_v55 }
 0x617   :  { %3410 = vmatpush1.bf16.msra.mxu0 %v4552_v57 }
 0x618   :  { %3411 = vmatprep.subr.bf16.mxu0 %v4560_v59 }
 0x61b   :  { %3412 = vmatpush1.bf16.msra.mxu0 %v4558_v61 }
 0x6b1   :  { %v2713_v17 = vpop.f32.mrb[20].mxu0 }
 0x6b2   :  { %v2714_v18 = vadd.f32 %v2713_v17, %v2512_v16  ;;  %v2715_v19 = vpop.f32.mrb[21].mxu0  ;;  %v3039_v16 = vld [vmem:[%s5171_s14] sm:$0xf]  ;;  %s4776_s14 = scalar_lea.vmem %s3496_s4, 512 }
 0x6b3   :  { %v2716_v20 = vadd.f32 %v2715_v19, %v2516_v34  ;;  %v2717_v21 = vpop.f32.mrb[22].mxu0  ;;  %v3055_v34 = vsub.s32 3, %v5098_v12  ;;  %v3044_v17 = vrot.slane %v3039_v16, %v5101_v13  ;;  %v3048_v19 = vrot.slane %v3039_v16, %v5107_v15  ;;  %p4777_p2 = scmp.ne.s32.totalorder %s3496_s4, %s4776_s14  ;;  %p4782_p4 = scmp.lt.s32.totalorder %s4776_s14, %s4776_s14 }
 0x6b4   :  { %v2720_v22 = vmax.f32 %v2714_v18, 0.0  ;;  %v2718_v23 = vpop.f32.mrb[23].mxu0  ;;  %v3052_v18 = vrot.slane %v3039_v16, %v3051_v14  ;;  %v3479_v21 = vpop.permute.xlu0 %3478 }
 0x6b5   :  { %v2721_v24 = vmax.f32 %v2716_v20, 0.0  ;;  %v3056_v20 = vrot.slane %v3039_v16, %v3055_v34  ;;  %p4783_p5 = por %p4782_p4, %p4781_p3 }
 0x6b6   :  { %v2722_v27 = vpack.c.bf16 %v2720_v22, %v2720_v22 }
 0x6b7   :  { %v2723_v25 = vpack.c.bf16 %v2721_v24, %v2721_v24  ;;  %p4784_p6 = pnand %p4783_p5, %p4777_p2 }
 0x6b9   :  { %2962 = vmatprep.mubr.bf16.mxu1 %v2723_v25 }
 0x6ba   :  { %2963 = vmatmul.mubr.bf16.vlgmr.msra.gmra.mrb[20].mxu1 %v2722_v27 }
 0x6bb   :  { %3423 = vmatpush1.bf16.msra.mxu1 %v4471_v26 }
 0x6bc   :  { %3424 = vmatprep.subr.bf16.mxu1 %v4479_v28 }
 0x6bf   :  { %3425 = vmatpush1.bf16.msra.mxu1 %v4477_v29 }
 0x6c0   :  { %3426 = vmatprep.subr.bf16.mxu1 %v4485_v30 }
 0x6c3   :  { %3427 = vmatpush1.bf16.msra.mxu1 %v4483_v31 }
 0x6c4   :  { %3428 = vmatprep.subr.bf16.mxu1 %v4491_v32 }
 0x6c7   :  { %3429 = vmatpush1.bf16.msra.mxu1 %v4489_v33 }
 0x6c8   :  { %3430 = vmatprep.subr.bf16.mxu1 %v4497_v35 }
 0x6cb   :  { %3431 = vmatpush1.bf16.msra.mxu1 %v4495_v36 }
 0x6cc   :  { %3432 = vmatprep.subr.bf16.mxu1 %v4503_v0 }
 0x6cf   :  { %3433 = vmatpush1.bf16.msra.mxu1 %v4501_v37 }
 0x6d0   :  { %3434 = vmatprep.subr.bf16.mxu1 %v4509_v38 }
 0x6d3   :  { %3435 = vmatpush1.bf16.msra.mxu1 %v4507_v40 }
 0x6d4   :  { %3436 = vmatprep.subr.bf16.mxu1 %v4515_v41 }
 0x6d7   :  { %3437 = vmatpush1.bf16.msra.mxu1 %v4513_v42 }
 0x6d8   :  { %3438 = vmatprep.subr.bf16.mxu1 %v4521_v43 }
 0x6db   :  { %3439 = vmatpush1.bf16.msra.mxu1 %v4519_v44 }
 0x6dc   :  { %3440 = vmatprep.subr.bf16.mxu1 %v4527_v45 }
 0x6df   :  { %3441 = vmatpush1.bf16.msra.mxu1 %v4525_v46 }
 0x6e0   :  { %3442 = vmatprep.subr.bf16.mxu1 %v4533_v47 }
 0x6e3   :  { %3443 = vmatpush1.bf16.msra.mxu1 %v4531_v48 }
 0x6e4   :  { %3444 = vmatprep.subr.bf16.mxu1 %v4539_v49 }
 0x6e7   :  { %3445 = vmatpush1.bf16.msra.mxu1 %v4537_v50 }
 0x6e8   :  { %3446 = vmatprep.subr.bf16.mxu1 %v4545_v51 }
 0x6eb   :  { %3447 = vmatpush1.bf16.msra.mxu1 %v4543_v52 }
 0x6ec   :  { %3448 = vmatprep.subr.bf16.mxu1 %v4551_v53 }
 0x6ef   :  { %3449 = vmatpush1.bf16.msra.mxu1 %v4549_v54 }
 0x6f0   :  { %3450 = vmatprep.subr.bf16.mxu1 %v4557_v56 }
 0x6f3   :  { %3451 = vmatpush1.bf16.msra.mxu1 %v4555_v58 }
 0x6f4   :  { %3452 = vmatprep.subr.bf16.mxu1 %v4563_v60 }
 0x6f7   :  { %3453 = vmatpush1.bf16.msra.mxu1 %v4561_v62 }
 0x78d   :  { %v2964_v2 = vpop.f32.mrb[20].mxu1 }
 0x78e   :  { %v2965_v3 = vadd.f32 %v2964_v2, %v2763_v63  ;;  %v2966_v4 = vpop.f32.mrb[21].mxu1 }
 0x78f   :  { %v2967_v5 = vadd.f32 %v2966_v4, %v2767_v1  ;;  %v2968_v6 = vpop.f32.mrb[22].mxu1 }
 0x790   :  { %v2971_v7 = vmax.f32 %v2965_v3, 0.0  ;;  %v2969_v8 = vpop.f32.mrb[23].mxu1 }
 0x791   :  { %v2972_v9 = vmax.f32 %v2967_v5, 0.0 }
 0x792   :  { %v2973_v11 = vpack.c.bf16 %v2971_v7, %v2971_v7 }
 0x793   :  { %v2974_v10 = vpack.c.bf16 %v2972_v9, %v2972_v9 }
 0x795   :  { %3413 = vmatprep.mubr.bf16.mxu0 %v2974_v10  ;;  %3454 = vmatprep.mubr.bf16.mxu1 %v2974_v10 }
 0x796   :  { %3414 = vmatmul.mubr.bf16.vlgmr.msra.gmra.mrb[24].mxu0 %v2973_v11  ;;  %3455 = vmatmul.mubr.bf16.vlgmr.msra.gmra.mrb[24].mxu1 %v2973_v11 }
 0x869   :  { %v3415_v22 = vpop.f32.mrb[24].mxu0  ;;  %v3456_v23 = vpop.f32.mrb[24].mxu1 }
 0x86a   :  { %v3416_v24 = vadd.f32 %v3415_v22, %v3044_v17  ;;  %v3457_v25 = vadd.f32 %v3456_v23, %v3052_v18  ;;  %v3417_v26 = vpop.f32.mrb[25].mxu0  ;;  %v3458_v27 = vpop.f32.mrb[25].mxu1 }
 0x86b   :  { %v3418_v28 = vadd.f32 %v3417_v26, %v3048_v19  ;;  %v3459_v29 = vadd.f32 %v3458_v27, %v3056_v20  ;;  %v3419_v30 = vpop.f32.mrb[26].mxu0  ;;  %v3460_v31 = vpop.f32.mrb[26].mxu1 }
 0x86c   :  { %v3481_v12 = vmul.f32 %v3479_v21, %v3416_v24  ;;  %v3483_v32 = vmul.f32 %v3479_v21, %v3457_v25  ;;  %v3420_v13 = vpop.f32.mrb[27].mxu0  ;;  %v3461_v33 = vpop.f32.mrb[27].mxu1 }
 0x86d   :  { %v3482_v35 = vmul.f32 %v3479_v21, %v3418_v28  ;;  %v3484_v15 = vmul.f32 %v3479_v21, %v3459_v29 }
 0x86e   :  { %3485 = vst [vmem:[#allocation17] sm:$0xff] %v3481_v12  ;;  %3487 = vst [vmem:[#allocation17 + $0x10] sm:$0xff] %v3483_v32 }
 0x86f   :  { %3486 = vst [vmem:[#allocation17 + $0x8] sm:$0xff] %v3482_v35  ;;  %3488 = vst [vmem:[#allocation17 + $0x18] sm:$0xff] %v3484_v15 }
 0x870   :  { %4787 = shalt.err (!%p4784_p6)
}
 0x871   :  { %s4788_s30 = scalar_lea.hbm %s5172_s15, 512 }
 0x872   :  { %p4789_p7 = scmp.ne.s32.totalorder %s5172_s15, %s4788_s30  ;;  %p4792_p8 = scmp.lt.u32.totalorder %s4788_s30, %s5172_s15 }
 0x874   :  { %p4794_p9 = pnand %p4792_p8, %p4789_p7 }
 0x876   :  { %4797 = shalt.err (!%p4794_p9)
}
 0x877   :  { %3498 = dma.vmem_to_hbm [thread:$0]  %s3496_s4, 512, %s5172_s15, [#allocation4]  }
 0x878   :  { %4808 = dma.done.wait [#allocation4], 512  }
 0x879   :  { %4809 = vsyncadd [#allocation4], 4294966784 }
 0x87a   :  { %3502 = vsyncpa [#allocation3], 1 }
 0x87b   :  { %3503 = vsyncpa [#allocation6], 1 }
 0x87c   :  { %3504 = vsyncpa [#allocation9], 1 }
 0x87d   :  { %3505 = vsyncpa [#allocation12], 1 }
 0x87e   :  { %3506 = vsyncpa [#allocation15], 1 }
 0x87f   :  { %3507 = vsyncpa [#allocation4], 1 }

</bundles_post_ra>
